<compile_context>
chip_gen: v7x
topology: tpu7x:2x2x1
jax: 0.10.0
libtpu: 0.0.40
codegen_flags: <defaults>
</compile_context>

<pallas_src>
import math

import jax
import jax.numpy as jnp
from jax.experimental import pallas as pl
from jax.experimental.pallas import tpu as pltpu

VOCAB = 256
HIDDEN = 128
N_HEADS = 4
HEAD_DIM = HIDDEN // N_HEADS
INTER = 256
N_LAYERS = 2
EPS = 1e-5
ROPE_THETA = 10000.0


# ----------------------------- in-kernel helpers ----------------------------

def _rmsnorm(x_bf16, w_bf16):
    # HF LlamaRMSNorm ordering: normalize in f32, cast back to bf16, scale.
    xf = x_bf16.astype(jnp.float32)
    var = jnp.mean(xf * xf, axis=-1, keepdims=True)
    inv = jax.lax.rsqrt(var + EPS)
    return (xf * inv).astype(jnp.bfloat16) * w_bf16


def _rope(xh, cos, sin):
    # xh: (S, HEAD_DIM) f32; rotate-half RoPE (HF convention), all f32.
    half = HEAD_DIM // 2
    x1 = xh[:, :half]
    x2 = xh[:, half:]
    rot = jnp.concatenate([-x2, x1], axis=-1)
    return xh * cos + rot * sin


# ------------------------------ fused kernel --------------------------------

def _llama_stack_kernel(x_emb_ref, cos_ref, sin_ref, ln1_ref, ln2_ref,
                        wqkv_ref, wo_ref, wgu_ref, wd_ref, lnf_ref, head_ref,
                        logits_ref, x_scratch):
    """One (batch, layer) grid step: full transformer layer on a VMEM-resident
    residual stream; final RMSNorm + lm_head fused into the last layer step."""
    l = pl.program_id(1)
    S = x_scratch.shape[0]
    scale = 1.0 / math.sqrt(HEAD_DIM)

    # Initialize the residual stream from the embeddings at layer 0.
    @pl.when(l == 0)
    def _():
        x_scratch[...] = x_emb_ref[0]

    x = x_scratch[...]                                        # (S, H) bf16

    # ---------------- self-attention block ----------------
    h = _rmsnorm(x, ln1_ref[0])                               # (S, H) bf16
    # Fused QKV projection: one MXU dot with N = 3*HIDDEN = 384.
    qkv = jnp.dot(h, wqkv_ref[0],
                  preferred_element_type=jnp.float32)         # (S, 3H) f32

    cos = cos_ref[...]
    sin = sin_ref[...]
    row = jax.lax.broadcasted_iota(jnp.int32, (S, S), 0)
    col = jax.lax.broadcasted_iota(jnp.int32, (S, S), 1)
    causal = col <= row

    head_outs = []
    for hidx in range(N_HEADS):                               # unrolled, tiny
        q_h = _rope(qkv[:, hidx * HEAD_DIM:(hidx + 1) * HEAD_DIM], cos, sin)
        k_h = _rope(qkv[:, HIDDEN + hidx * HEAD_DIM:
                           HIDDEN + (hidx + 1) * HEAD_DIM], cos, sin)
        v_h = qkv[:, 2 * HIDDEN + hidx * HEAD_DIM:
                     2 * HIDDEN + (hidx + 1) * HEAD_DIM]
        s = jnp.dot(q_h, k_h.T, preferred_element_type=jnp.float32) * scale
        s = jnp.where(causal, s, -1e30)
        m = jnp.max(s, axis=-1, keepdims=True)
        p = jnp.exp(s - m)
        p = p * pl.reciprocal(jnp.sum(p, axis=-1, keepdims=True), approx=True)
        head_outs.append(jnp.dot(p, v_h, preferred_element_type=jnp.float32))
    attn = jnp.concatenate(head_outs, axis=-1).astype(jnp.bfloat16)  # (S, H)

    attn_out = jnp.dot(attn, wo_ref[0],
                       preferred_element_type=jnp.float32)    # (S, H) f32
    x = x + attn_out.astype(jnp.bfloat16)                     # fused residual

    # ---------------- MLP block (SwiGLU, fused gate/up) ----------------
    h2 = _rmsnorm(x, ln2_ref[0])                              # (S, H) bf16
    gu = jnp.dot(h2, wgu_ref[0],
                 preferred_element_type=jnp.float32)          # (S, 2*INTER)
    g = gu[:, :INTER]
    u = gu[:, INTER:]
    act = (g * jax.nn.sigmoid(g)) * u                         # silu(g) * u
    mlp = jnp.dot(act.astype(jnp.bfloat16), wd_ref[0],
                  preferred_element_type=jnp.float32)         # (S, H) f32
    x = x + mlp.astype(jnp.bfloat16)                          # fused residual

    x_scratch[...] = x

    # ---------------- final norm + lm_head (last layer only) ----------------
    @pl.when(l == pl.num_programs(1) - 1)
    def _():
        xf = _rmsnorm(x, lnf_ref[...])                        # (S, H) bf16
        logits_ref[0] = jnp.dot(xf, head_ref[...],
                                preferred_element_type=jnp.float32)


# ------------------------------- JAX wrapper ---------------------------------

def rope_tables(seq_len):
    inv_freq = 1.0 / (ROPE_THETA ** (
        jnp.arange(0, HEAD_DIM, 2, dtype=jnp.float32) / HEAD_DIM))
    pos = jnp.arange(seq_len, dtype=jnp.float32)
    freqs = pos[:, None] * inv_freq[None, :]                  # (S, hd/2)
    emb = jnp.concatenate([freqs, freqs], axis=-1)            # (S, hd)
    return jnp.cos(emb), jnp.sin(emb)                         # (S, hd) f32


def init_params(key):
    def nrm(k, shape, scale=0.02):
        return (scale * jax.random.normal(k, shape, dtype=jnp.float32)
                ).astype(jnp.bfloat16)

    keys = jax.random.split(key, 2 + N_LAYERS)
    params = {
        "embed": nrm(keys[0], (VOCAB, HIDDEN)),
        "ln_f": jnp.ones((1, HIDDEN), dtype=jnp.bfloat16),
        "lm_head": nrm(keys[1], (HIDDEN, VOCAB)),
        "ln1": jnp.ones((N_LAYERS, 1, HIDDEN), dtype=jnp.bfloat16),
        "ln2": jnp.ones((N_LAYERS, 1, HIDDEN), dtype=jnp.bfloat16),
    }
    wqkv, wo, wgu, wd = [], [], [], []
    for l in range(N_LAYERS):
        lk = jax.random.split(keys[2 + l], 7)
        wq = nrm(lk[0], (HIDDEN, HIDDEN))
        wk = nrm(lk[1], (HIDDEN, HIDDEN))
        wv = nrm(lk[2], (HIDDEN, HIDDEN))
        wqkv.append(jnp.concatenate([wq, wk, wv], axis=-1))   # (H, 3H)
        wo.append(nrm(lk[3], (HIDDEN, HIDDEN)))
        wg = nrm(lk[4], (HIDDEN, INTER))
        wu = nrm(lk[5], (HIDDEN, INTER))
        wgu.append(jnp.concatenate([wg, wu], axis=-1))        # (H, 2*INTER)
        wd.append(nrm(lk[6], (INTER, HIDDEN)))
    params["wqkv"] = jnp.stack(wqkv)                          # (L, H, 3H)
    params["wo"] = jnp.stack(wo)                              # (L, H, H)
    params["wgu"] = jnp.stack(wgu)                            # (L, H, 2I)
    params["wd"] = jnp.stack(wd)                              # (L, I, H)
    return params


@jax.jit
def llama2_forward(params, input_ids):
    """input_ids: (B, S) int32 -> logits (B, S, VOCAB) float32."""
    B, S = input_ids.shape
    x = jnp.take(params["embed"], input_ids, axis=0)          # (B, S, H) bf16
    cos, sin = rope_tables(S)                                 # (S, hd) f32

    logits = pl.pallas_call(
        _llama_stack_kernel,
        out_shape=jax.ShapeDtypeStruct((B, S, VOCAB), jnp.float32),
        grid=(B, N_LAYERS),
        in_specs=[
            pl.BlockSpec((1, S, HIDDEN), lambda b, l: (b, 0, 0)),          # x_emb
            pl.BlockSpec((S, HEAD_DIM), lambda b, l: (0, 0)),              # cos
            pl.BlockSpec((S, HEAD_DIM), lambda b, l: (0, 0)),              # sin
            pl.BlockSpec((1, 1, HIDDEN), lambda b, l: (l, 0, 0)),          # ln1
            pl.BlockSpec((1, 1, HIDDEN), lambda b, l: (l, 0, 0)),          # ln2
            pl.BlockSpec((1, HIDDEN, 3 * HIDDEN), lambda b, l: (l, 0, 0)),  # wqkv
            pl.BlockSpec((1, HIDDEN, HIDDEN), lambda b, l: (l, 0, 0)),      # wo
            pl.BlockSpec((1, HIDDEN, 2 * INTER), lambda b, l: (l, 0, 0)),   # wgu
            pl.BlockSpec((1, INTER, HIDDEN), lambda b, l: (l, 0, 0)),       # wd
            pl.BlockSpec((1, HIDDEN), lambda b, l: (0, 0)),                # ln_f
            pl.BlockSpec((HIDDEN, VOCAB), lambda b, l: (0, 0)),            # lm_head
        ],
        out_specs=pl.BlockSpec((1, S, VOCAB), lambda b, l: (b, 0, 0)),
        scratch_shapes=[pltpu.VMEM((S, HIDDEN), jnp.bfloat16)],
        compiler_params=pltpu.CompilerParams(
            dimension_semantics=("parallel", "arbitrary")),
    )(x, cos, sin, params["ln1"], params["ln2"], params["wqkv"],
      params["wo"], params["wgu"], params["wd"], params["ln_f"],
      params["lm_head"])
    return logits


if __name__ == "__main__":
    key = jax.random.PRNGKey(0)
    pkey, ikey = jax.random.split(key)
    params = init_params(pkey)
    # Stand-in for tokenizer output: deterministic token ids, batch=2, seq=8.
    input_ids = jax.random.randint(ikey, (2, 8), 0, VOCAB, dtype=jnp.int32)

    logits = llama2_forward(params, input_ids)
    jax.block_until_ready(logits)
    assert logits.shape == (2, 8, VOCAB) and logits.dtype == jnp.float32
    assert bool(jnp.all(jnp.isfinite(logits)))
    print("KERNEL_OK")
</pallas_src>

<mosaic_0001>
module attributes {stable_mosaic.version = 11 : i64} {
  func.func @_llama_stack_kernel(%arg0: i32, %arg1: i32, %arg2: memref<1x8x128xbf16, #tpu.memory_space<vmem>>, %arg3: memref<8x32xf32, #tpu.memory_space<vmem>>, %arg4: memref<8x32xf32, #tpu.memory_space<vmem>>, %arg5: memref<1x1x128xbf16, #tpu.memory_space<vmem>>, %arg6: memref<1x1x128xbf16, #tpu.memory_space<vmem>>, %arg7: memref<1x128x384xbf16, #tpu.memory_space<vmem>>, %arg8: memref<1x128x128xbf16, #tpu.memory_space<vmem>>, %arg9: memref<1x128x512xbf16, #tpu.memory_space<vmem>>, %arg10: memref<1x256x128xbf16, #tpu.memory_space<vmem>>, %arg11: memref<1x128xbf16, #tpu.memory_space<vmem>>, %arg12: memref<128x256xbf16, #tpu.memory_space<vmem>>, %arg13: memref<1x8x256xf32, #tpu.memory_space<vmem>>, %arg14: memref<8x128xbf16, #tpu.memory_space<vmem>>) attributes {dimension_semantics = [#tpu.dimension_semantics<parallel>, #tpu.dimension_semantics<arbitrary>], iteration_bounds = array<i64: 2, 2>, scalar_prefetch = 0 : i64, scratch_operands = 1 : i64, tpu.core_type = #tpu.core_type<tc>, window_params = [{transform_indices = @transform_0, window_bounds = array<i64: 1, 8, 128>}, {pipeline_mode = #tpu.pipeline_mode<synchronous>, transform_indices = @transform_1, window_bounds = array<i64: 8, 32>}, {pipeline_mode = #tpu.pipeline_mode<synchronous>, transform_indices = @transform_2, window_bounds = array<i64: 8, 32>}, {transform_indices = @transform_3, window_bounds = array<i64: 1, 1, 128>}, {transform_indices = @transform_4, window_bounds = array<i64: 1, 1, 128>}, {transform_indices = @transform_5, window_bounds = array<i64: 1, 128, 384>}, {transform_indices = @transform_6, window_bounds = array<i64: 1, 128, 128>}, {transform_indices = @transform_7, window_bounds = array<i64: 1, 128, 512>}, {transform_indices = @transform_8, window_bounds = array<i64: 1, 256, 128>}, {pipeline_mode = #tpu.pipeline_mode<synchronous>, transform_indices = @transform_9, window_bounds = array<i64: 1, 128>}, {pipeline_mode = #tpu.pipeline_mode<synchronous>, transform_indices = @transform_10, window_bounds = array<i64: 128, 256>}, {transform_indices = @transform_11, window_bounds = array<i64: 1, 8, 256>}]} {
    %c0_i32 = arith.constant 0 : i32
    %0 = arith.cmpi eq, %arg1, %c0_i32 : i32
    %1 = arith.extui %0 : i1 to i32
    %c0_i32_0 = arith.constant 0 : i32
    %2 = arith.cmpi ne, %1, %c0_i32_0 : i32
    scf.if %2 {
      %c0_69 = arith.constant 0 : index
      %c0_70 = arith.constant 0 : index
      %c0_71 = arith.constant 0 : index
      %217 = vector.load %arg2[%c0_69, %c0_70, %c0_71] : memref<1x8x128xbf16, #tpu.memory_space<vmem>>, vector<1x8x128xbf16>
      %218 = vector.shape_cast %217 : vector<1x8x128xbf16> to vector<8x128xbf16>
      %c0_72 = arith.constant 0 : index
      %c0_73 = arith.constant 0 : index
      %219 = vector.load %arg14[%c0_72, %c0_73] : memref<8x128xbf16, #tpu.memory_space<vmem>>, vector<8x128xbf16>
      tpu.vector_store %arg14[%c0_72, %c0_73], %218 {strides = array<i32>} : memref<8x128xbf16, #tpu.memory_space<vmem>>, vector<8x128xbf16>,
    } else {
    }
    %c0 = arith.constant 0 : index
    %c0_1 = arith.constant 0 : index
    %3 = vector.load %arg14[%c0, %c0_1] : memref<8x128xbf16, #tpu.memory_space<vmem>>, vector<8x128xbf16>
    %c0_2 = arith.constant 0 : index
    %c0_3 = arith.constant 0 : index
    %c0_4 = arith.constant 0 : index
    %4 = vector.load %arg5[%c0_2, %c0_3, %c0_4] : memref<1x1x128xbf16, #tpu.memory_space<vmem>>, vector<1x1x128xbf16>
    %5 = vector.shape_cast %4 : vector<1x1x128xbf16> to vector<1x128xbf16>
    %6 = arith.extf %3 : vector<8x128xbf16> to vector<8x128xf32>
    %7 = arith.mulf %6, %6 : vector<8x128xf32>
    %cst = arith.constant dense<0.000000e+00> : vector<8xf32>
    %8 = vector.multi_reduction <add>, %7, %cst [1] : vector<8x128xf32> to vector<8xf32>
    %9 = vector.shape_cast %8 : vector<8xf32> to vector<8x1xf32>
    %cst_5 = arith.constant 1.280000e+02 : f32
    %10 = vector.broadcast %cst_5 : f32 to vector<8x1xf32>
    %11 = arith.divf %9, %10 : vector<8x1xf32>
    %cst_6 = arith.constant 9.99999974E-6 : f32
    %12 = vector.broadcast %cst_6 : f32 to vector<8x1xf32>
    %13 = arith.addf %11, %12 : vector<8x1xf32>
    %14 = math.rsqrt %13 : vector<8x1xf32>
    %15 = vector.broadcast %14 : vector<8x1xf32> to vector<8x128xf32>
    %16 = arith.mulf %6, %15 : vector<8x128xf32>
    %17 = arith.truncf %16 : vector<8x128xf32> to vector<8x128xbf16>
    %18 = vector.broadcast %5 : vector<1x128xbf16> to vector<8x128xbf16>
    %19 = arith.mulf %17, %18 : vector<8x128xbf16>
    %c0_7 = arith.constant 0 : index
    %c0_8 = arith.constant 0 : index
    %c0_9 = arith.constant 0 : index
    %20 = vector.load %arg7[%c0_7, %c0_8, %c0_9] : memref<1x128x384xbf16, #tpu.memory_space<vmem>>, vector<1x128x384xbf16>
    %21 = vector.shape_cast %20 : vector<1x128x384xbf16> to vector<128x384xbf16>
    %cst_10 = arith.constant dense<0.000000e+00> : vector<8x384xf32>
    %22 = tpu.matmul %19, %21, %cst_10 {dimension_numbers = #tpu.dot_dimension_numbers<[1], [0], [0], [1], [0, 0, 1, 1], [], []>} : vector<8x128xbf16>, vector<128x384xbf16>, vector<8x384xf32> -> vector<8x384xf32>
    %c0_11 = arith.constant 0 : index
    %c0_12 = arith.constant 0 : index
    %23 = vector.load %arg3[%c0_11, %c0_12] : memref<8x32xf32, #tpu.memory_space<vmem>>, vector<8x32xf32>
    %c0_13 = arith.constant 0 : index
    %c0_14 = arith.constant 0 : index
    %24 = vector.load %arg4[%c0_13, %c0_14] : memref<8x32xf32, #tpu.memory_space<vmem>>, vector<8x32xf32>
    %25 = tpu.iota {dimensions = array<i32: 0>} : vector<8x8xi32>
    %26 = tpu.iota {dimensions = array<i32: 1>} : vector<8x8xi32>
    %27 = arith.cmpi sle, %26, %25 : vector<8x8xi32>
    %28 = vector.extract_strided_slice %22 {offsets = [0, 0], sizes = [8, 32], strides = [1, 1]} : vector<8x384xf32> to vector<8x32xf32>
    %29 = vector.extract_strided_slice %28 {offsets = [0, 0], sizes = [8, 16], strides = [1, 1]} : vector<8x32xf32> to vector<8x16xf32>
    %30 = vector.extract_strided_slice %28 {offsets = [0, 16], sizes = [8, 16], strides = [1, 1]} : vector<8x32xf32> to vector<8x16xf32>
    %cst_15 = arith.constant 0.000000e+00 : f32
    %31 = vector.broadcast %cst_15 : f32 to vector<8x16xf32>
    %32 = arith.subf %31, %30 : vector<8x16xf32>
    %33 = tpu.concatenate %32, %29 in 1 : vector<8x16xf32>, vector<8x16xf32> -> vector<8x32xf32>
    %34 = arith.mulf %28, %23 : vector<8x32xf32>
    %35 = arith.mulf %33, %24 : vector<8x32xf32>
    %36 = arith.addf %34, %35 : vector<8x32xf32>
    %37 = vector.extract_strided_slice %22 {offsets = [0, 128], sizes = [8, 32], strides = [1, 1]} : vector<8x384xf32> to vector<8x32xf32>
    %38 = vector.extract_strided_slice %37 {offsets = [0, 0], sizes = [8, 16], strides = [1, 1]} : vector<8x32xf32> to vector<8x16xf32>
    %39 = vector.extract_strided_slice %37 {offsets = [0, 16], sizes = [8, 16], strides = [1, 1]} : vector<8x32xf32> to vector<8x16xf32>
    %cst_16 = arith.constant 0.000000e+00 : f32
    %40 = vector.broadcast %cst_16 : f32 to vector<8x16xf32>
    %41 = arith.subf %40, %39 : vector<8x16xf32>
    %42 = tpu.concatenate %41, %38 in 1 : vector<8x16xf32>, vector<8x16xf32> -> vector<8x32xf32>
    %43 = arith.mulf %37, %23 : vector<8x32xf32>
    %44 = arith.mulf %42, %24 : vector<8x32xf32>
    %45 = arith.addf %43, %44 : vector<8x32xf32>
    %46 = vector.extract_strided_slice %22 {offsets = [0, 256], sizes = [8, 32], strides = [1, 1]} : vector<8x384xf32> to vector<8x32xf32>
    %47 = tpu.transpose %45, [1, 0] : vector<8x32xf32> -> vector<32x8xf32>
    %cst_17 = arith.constant dense<0.000000e+00> : vector<8x8xf32>
    %48 = tpu.matmul %36, %47, %cst_17 {dimension_numbers = #tpu.dot_dimension_numbers<[1], [0], [0], [1], [0, 0, 1, 1], [], []>} : vector<8x32xf32>, vector<32x8xf32>, vector<8x8xf32> -> vector<8x8xf32>
    %cst_18 = arith.constant 0.176776692 : f32
    %49 = vector.broadcast %cst_18 : f32 to vector<8x8xf32>
    %50 = arith.mulf %48, %49 : vector<8x8xf32>
    %cst_19 = arith.constant -1.000000e+30 : f32
    %51 = vector.broadcast %cst_19 : f32 to vector<8x8xf32>
    %52 = arith.select %27, %50, %51 : vector<8x8xi1>, vector<8x8xf32>
    %cst_20 = arith.constant dense<0xFF800000> : vector<8xf32>
    %53 = vector.multi_reduction <maximumf>, %52, %cst_20 [1] : vector<8x8xf32> to vector<8xf32>
    %54 = vector.shape_cast %53 : vector<8xf32> to vector<8x1xf32>
    %55 = vector.broadcast %54 : vector<8x1xf32> to vector<8x8xf32>
    %56 = arith.subf %52, %55 : vector<8x8xf32>
    %57 = math.exp %56 : vector<8x8xf32>
    %cst_21 = arith.constant dense<0.000000e+00> : vector<8xf32>
    %58 = vector.multi_reduction <add>, %57, %cst_21 [1] : vector<8x8xf32> to vector<8xf32>
    %59 = vector.shape_cast %58 : vector<8xf32> to vector<8x1xf32>
    %60 = tpu.reciprocal %59 {approx = true} : vector<8x1xf32> -> vector<8x1xf32>
    %61 = vector.broadcast %60 : vector<8x1xf32> to vector<8x8xf32>
    %62 = arith.mulf %57, %61 : vector<8x8xf32>
    %cst_22 = arith.constant dense<0.000000e+00> : vector<8x32xf32>
    %63 = tpu.matmul %62, %46, %cst_22 {dimension_numbers = #tpu.dot_dimension_numbers<[1], [0], [0], [1], [0, 0, 1, 1], [], []>} : vector<8x8xf32>, vector<8x32xf32>, vector<8x32xf32> -> vector<8x32xf32>
    %64 = vector.extract_strided_slice %22 {offsets = [0, 32], sizes = [8, 32], strides = [1, 1]} : vector<8x384xf32> to vector<8x32xf32>
    %65 = vector.extract_strided_slice %64 {offsets = [0, 0], sizes = [8, 16], strides = [1, 1]} : vector<8x32xf32> to vector<8x16xf32>
    %66 = vector.extract_strided_slice %64 {offsets = [0, 16], sizes = [8, 16], strides = [1, 1]} : vector<8x32xf32> to vector<8x16xf32>
    %cst_23 = arith.constant 0.000000e+00 : f32
    %67 = vector.broadcast %cst_23 : f32 to vector<8x16xf32>
    %68 = arith.subf %67, %66 : vector<8x16xf32>
    %69 = tpu.concatenate %68, %65 in 1 : vector<8x16xf32>, vector<8x16xf32> -> vector<8x32xf32>
    %70 = arith.mulf %64, %23 : vector<8x32xf32>
    %71 = arith.mulf %69, %24 : vector<8x32xf32>
    %72 = arith.addf %70, %71 : vector<8x32xf32>
    %73 = vector.extract_strided_slice %22 {offsets = [0, 160], sizes = [8, 32], strides = [1, 1]} : vector<8x384xf32> to vector<8x32xf32>
    %74 = vector.extract_strided_slice %73 {offsets = [0, 0], sizes = [8, 16], strides = [1, 1]} : vector<8x32xf32> to vector<8x16xf32>
    %75 = vector.extract_strided_slice %73 {offsets = [0, 16], sizes = [8, 16], strides = [1, 1]} : vector<8x32xf32> to vector<8x16xf32>
    %cst_24 = arith.constant 0.000000e+00 : f32
    %76 = vector.broadcast %cst_24 : f32 to vector<8x16xf32>
    %77 = arith.subf %76, %75 : vector<8x16xf32>
    %78 = tpu.concatenate %77, %74 in 1 : vector<8x16xf32>, vector<8x16xf32> -> vector<8x32xf32>
    %79 = arith.mulf %73, %23 : vector<8x32xf32>
    %80 = arith.mulf %78, %24 : vector<8x32xf32>
    %81 = arith.addf %79, %80 : vector<8x32xf32>
    %82 = vector.extract_strided_slice %22 {offsets = [0, 288], sizes = [8, 32], strides = [1, 1]} : vector<8x384xf32> to vector<8x32xf32>
    %83 = tpu.transpose %81, [1, 0] : vector<8x32xf32> -> vector<32x8xf32>
    %cst_25 = arith.constant dense<0.000000e+00> : vector<8x8xf32>
    %84 = tpu.matmul %72, %83, %cst_25 {dimension_numbers = #tpu.dot_dimension_numbers<[1], [0], [0], [1], [0, 0, 1, 1], [], []>} : vector<8x32xf32>, vector<32x8xf32>, vector<8x8xf32> -> vector<8x8xf32>
    %cst_26 = arith.constant 0.176776692 : f32
    %85 = vector.broadcast %cst_26 : f32 to vector<8x8xf32>
    %86 = arith.mulf %84, %85 : vector<8x8xf32>
    %cst_27 = arith.constant -1.000000e+30 : f32
    %87 = vector.broadcast %cst_27 : f32 to vector<8x8xf32>
    %88 = arith.select %27, %86, %87 : vector<8x8xi1>, vector<8x8xf32>
    %cst_28 = arith.constant dense<0xFF800000> : vector<8xf32>
    %89 = vector.multi_reduction <maximumf>, %88, %cst_28 [1] : vector<8x8xf32> to vector<8xf32>
    %90 = vector.shape_cast %89 : vector<8xf32> to vector<8x1xf32>
    %91 = vector.broadcast %90 : vector<8x1xf32> to vector<8x8xf32>
    %92 = arith.subf %88, %91 : vector<8x8xf32>
    %93 = math.exp %92 : vector<8x8xf32>
    %cst_29 = arith.constant dense<0.000000e+00> : vector<8xf32>
    %94 = vector.multi_reduction <add>, %93, %cst_29 [1] : vector<8x8xf32> to vector<8xf32>
    %95 = vector.shape_cast %94 : vector<8xf32> to vector<8x1xf32>
    %96 = tpu.reciprocal %95 {approx = true} : vector<8x1xf32> -> vector<8x1xf32>
    %97 = vector.broadcast %96 : vector<8x1xf32> to vector<8x8xf32>
    %98 = arith.mulf %93, %97 : vector<8x8xf32>
    %cst_30 = arith.constant dense<0.000000e+00> : vector<8x32xf32>
    %99 = tpu.matmul %98, %82, %cst_30 {dimension_numbers = #tpu.dot_dimension_numbers<[1], [0], [0], [1], [0, 0, 1, 1], [], []>} : vector<8x8xf32>, vector<8x32xf32>, vector<8x32xf32> -> vector<8x32xf32>
    %100 = vector.extract_strided_slice %22 {offsets = [0, 64], sizes = [8, 32], strides = [1, 1]} : vector<8x384xf32> to vector<8x32xf32>
    %101 = vector.extract_strided_slice %100 {offsets = [0, 0], sizes = [8, 16], strides = [1, 1]} : vector<8x32xf32> to vector<8x16xf32>
    %102 = vector.extract_strided_slice %100 {offsets = [0, 16], sizes = [8, 16], strides = [1, 1]} : vector<8x32xf32> to vector<8x16xf32>
    %cst_31 = arith.constant 0.000000e+00 : f32
    %103 = vector.broadcast %cst_31 : f32 to vector<8x16xf32>
    %104 = arith.subf %103, %102 : vector<8x16xf32>
    %105 = tpu.concatenate %104, %101 in 1 : vector<8x16xf32>, vector<8x16xf32> -> vector<8x32xf32>
    %106 = arith.mulf %100, %23 : vector<8x32xf32>
    %107 = arith.mulf %105, %24 : vector<8x32xf32>
    %108 = arith.addf %106, %107 : vector<8x32xf32>
    %109 = vector.extract_strided_slice %22 {offsets = [0, 192], sizes = [8, 32], strides = [1, 1]} : vector<8x384xf32> to vector<8x32xf32>
    %110 = vector.extract_strided_slice %109 {offsets = [0, 0], sizes = [8, 16], strides = [1, 1]} : vector<8x32xf32> to vector<8x16xf32>
    %111 = vector.extract_strided_slice %109 {offsets = [0, 16], sizes = [8, 16], strides = [1, 1]} : vector<8x32xf32> to vector<8x16xf32>
    %cst_32 = arith.constant 0.000000e+00 : f32
    %112 = vector.broadcast %cst_32 : f32 to vector<8x16xf32>
    %113 = arith.subf %112, %111 : vector<8x16xf32>
    %114 = tpu.concatenate %113, %110 in 1 : vector<8x16xf32>, vector<8x16xf32> -> vector<8x32xf32>
    %115 = arith.mulf %109, %23 : vector<8x32xf32>
    %116 = arith.mulf %114, %24 : vector<8x32xf32>
    %117 = arith.addf %115, %116 : vector<8x32xf32>
    %118 = vector.extract_strided_slice %22 {offsets = [0, 320], sizes = [8, 32], strides = [1, 1]} : vector<8x384xf32> to vector<8x32xf32>
    %119 = tpu.transpose %117, [1, 0] : vector<8x32xf32> -> vector<32x8xf32>
    %cst_33 = arith.constant dense<0.000000e+00> : vector<8x8xf32>
    %120 = tpu.matmul %108, %119, %cst_33 {dimension_numbers = #tpu.dot_dimension_numbers<[1], [0], [0], [1], [0, 0, 1, 1], [], []>} : vector<8x32xf32>, vector<32x8xf32>, vector<8x8xf32> -> vector<8x8xf32>
    %cst_34 = arith.constant 0.176776692 : f32
    %121 = vector.broadcast %cst_34 : f32 to vector<8x8xf32>
    %122 = arith.mulf %120, %121 : vector<8x8xf32>
    %cst_35 = arith.constant -1.000000e+30 : f32
    %123 = vector.broadcast %cst_35 : f32 to vector<8x8xf32>
    %124 = arith.select %27, %122, %123 : vector<8x8xi1>, vector<8x8xf32>
    %cst_36 = arith.constant dense<0xFF800000> : vector<8xf32>
    %125 = vector.multi_reduction <maximumf>, %124, %cst_36 [1] : vector<8x8xf32> to vector<8xf32>
    %126 = vector.shape_cast %125 : vector<8xf32> to vector<8x1xf32>
    %127 = vector.broadcast %126 : vector<8x1xf32> to vector<8x8xf32>
    %128 = arith.subf %124, %127 : vector<8x8xf32>
    %129 = math.exp %128 : vector<8x8xf32>
    %cst_37 = arith.constant dense<0.000000e+00> : vector<8xf32>
    %130 = vector.multi_reduction <add>, %129, %cst_37 [1] : vector<8x8xf32> to vector<8xf32>
    %131 = vector.shape_cast %130 : vector<8xf32> to vector<8x1xf32>
    %132 = tpu.reciprocal %131 {approx = true} : vector<8x1xf32> -> vector<8x1xf32>
    %133 = vector.broadcast %132 : vector<8x1xf32> to vector<8x8xf32>
    %134 = arith.mulf %129, %133 : vector<8x8xf32>
    %cst_38 = arith.constant dense<0.000000e+00> : vector<8x32xf32>
    %135 = tpu.matmul %134, %118, %cst_38 {dimension_numbers = #tpu.dot_dimension_numbers<[1], [0], [0], [1], [0, 0, 1, 1], [], []>} : vector<8x8xf32>, vector<8x32xf32>, vector<8x32xf32> -> vector<8x32xf32>
    %136 = vector.extract_strided_slice %22 {offsets = [0, 96], sizes = [8, 32], strides = [1, 1]} : vector<8x384xf32> to vector<8x32xf32>
    %137 = vector.extract_strided_slice %136 {offsets = [0, 0], sizes = [8, 16], strides = [1, 1]} : vector<8x32xf32> to vector<8x16xf32>
    %138 = vector.extract_strided_slice %136 {offsets = [0, 16], sizes = [8, 16], strides = [1, 1]} : vector<8x32xf32> to vector<8x16xf32>
    %cst_39 = arith.constant 0.000000e+00 : f32
    %139 = vector.broadcast %cst_39 : f32 to vector<8x16xf32>
    %140 = arith.subf %139, %138 : vector<8x16xf32>
    %141 = tpu.concatenate %140, %137 in 1 : vector<8x16xf32>, vector<8x16xf32> -> vector<8x32xf32>
    %142 = arith.mulf %136, %23 : vector<8x32xf32>
    %143 = arith.mulf %141, %24 : vector<8x32xf32>
    %144 = arith.addf %142, %143 : vector<8x32xf32>
    %145 = vector.extract_strided_slice %22 {offsets = [0, 224], sizes = [8, 32], strides = [1, 1]} : vector<8x384xf32> to vector<8x32xf32>
    %146 = vector.extract_strided_slice %145 {offsets = [0, 0], sizes = [8, 16], strides = [1, 1]} : vector<8x32xf32> to vector<8x16xf32>
    %147 = vector.extract_strided_slice %145 {offsets = [0, 16], sizes = [8, 16], strides = [1, 1]} : vector<8x32xf32> to vector<8x16xf32>
    %cst_40 = arith.constant 0.000000e+00 : f32
    %148 = vector.broadcast %cst_40 : f32 to vector<8x16xf32>
    %149 = arith.subf %148, %147 : vector<8x16xf32>
    %150 = tpu.concatenate %149, %146 in 1 : vector<8x16xf32>, vector<8x16xf32> -> vector<8x32xf32>
    %151 = arith.mulf %145, %23 : vector<8x32xf32>
    %152 = arith.mulf %150, %24 : vector<8x32xf32>
    %153 = arith.addf %151, %152 : vector<8x32xf32>
    %154 = vector.extract_strided_slice %22 {offsets = [0, 352], sizes = [8, 32], strides = [1, 1]} : vector<8x384xf32> to vector<8x32xf32>
    %155 = tpu.transpose %153, [1, 0] : vector<8x32xf32> -> vector<32x8xf32>
    %cst_41 = arith.constant dense<0.000000e+00> : vector<8x8xf32>
    %156 = tpu.matmul %144, %155, %cst_41 {dimension_numbers = #tpu.dot_dimension_numbers<[1], [0], [0], [1], [0, 0, 1, 1], [], []>} : vector<8x32xf32>, vector<32x8xf32>, vector<8x8xf32> -> vector<8x8xf32>
    %cst_42 = arith.constant 0.176776692 : f32
    %157 = vector.broadcast %cst_42 : f32 to vector<8x8xf32>
    %158 = arith.mulf %156, %157 : vector<8x8xf32>
    %cst_43 = arith.constant -1.000000e+30 : f32
    %159 = vector.broadcast %cst_43 : f32 to vector<8x8xf32>
    %160 = arith.select %27, %158, %159 : vector<8x8xi1>, vector<8x8xf32>
    %cst_44 = arith.constant dense<0xFF800000> : vector<8xf32>
    %161 = vector.multi_reduction <maximumf>, %160, %cst_44 [1] : vector<8x8xf32> to vector<8xf32>
    %162 = vector.shape_cast %161 : vector<8xf32> to vector<8x1xf32>
    %163 = vector.broadcast %162 : vector<8x1xf32> to vector<8x8xf32>
    %164 = arith.subf %160, %163 : vector<8x8xf32>
    %165 = math.exp %164 : vector<8x8xf32>
    %cst_45 = arith.constant dense<0.000000e+00> : vector<8xf32>
    %166 = vector.multi_reduction <add>, %165, %cst_45 [1] : vector<8x8xf32> to vector<8xf32>
    %167 = vector.shape_cast %166 : vector<8xf32> to vector<8x1xf32>
    %168 = tpu.reciprocal %167 {approx = true} : vector<8x1xf32> -> vector<8x1xf32>
    %169 = vector.broadcast %168 : vector<8x1xf32> to vector<8x8xf32>
    %170 = arith.mulf %165, %169 : vector<8x8xf32>
    %cst_46 = arith.constant dense<0.000000e+00> : vector<8x32xf32>
    %171 = tpu.matmul %170, %154, %cst_46 {dimension_numbers = #tpu.dot_dimension_numbers<[1], [0], [0], [1], [0, 0, 1, 1], [], []>} : vector<8x8xf32>, vector<8x32xf32>, vector<8x32xf32> -> vector<8x32xf32>
    %172 = tpu.concatenate %63, %99, %135, %171 in 1 : vector<8x32xf32>, vector<8x32xf32>, vector<8x32xf32>, vector<8x32xf32> -> vector<8x128xf32>
    %173 = arith.truncf %172 : vector<8x128xf32> to vector<8x128xbf16>
    %c0_47 = arith.constant 0 : index
    %c0_48 = arith.constant 0 : index
    %c0_49 = arith.constant 0 : index
    %174 = vector.load %arg8[%c0_47, %c0_48, %c0_49] : memref<1x128x128xbf16, #tpu.memory_space<vmem>>, vector<1x128x128xbf16>
    %175 = vector.shape_cast %174 : vector<1x128x128xbf16> to vector<128x128xbf16>
    %cst_50 = arith.constant dense<0.000000e+00> : vector<8x128xf32>
    %176 = tpu.matmul %173, %175, %cst_50 {dimension_numbers = #tpu.dot_dimension_numbers<[1], [0], [0], [1], [0, 0, 1, 1], [], []>} : vector<8x128xbf16>, vector<128x128xbf16>, vector<8x128xf32> -> vector<8x128xf32>
    %177 = arith.truncf %176 : vector<8x128xf32> to vector<8x128xbf16>
    %178 = arith.addf %3, %177 : vector<8x128xbf16>
    %c0_51 = arith.constant 0 : index
    %c0_52 = arith.constant 0 : index
    %c0_53 = arith.constant 0 : index
    %179 = vector.load %arg6[%c0_51, %c0_52, %c0_53] : memref<1x1x128xbf16, #tpu.memory_space<vmem>>, vector<1x1x128xbf16>
    %180 = vector.shape_cast %179 : vector<1x1x128xbf16> to vector<1x128xbf16>
    %181 = arith.extf %178 : vector<8x128xbf16> to vector<8x128xf32>
    %182 = arith.mulf %181, %181 : vector<8x128xf32>
    %cst_54 = arith.constant dense<0.000000e+00> : vector<8xf32>
    %183 = vector.multi_reduction <add>, %182, %cst_54 [1] : vector<8x128xf32> to vector<8xf32>
    %184 = vector.shape_cast %183 : vector<8xf32> to vector<8x1xf32>
    %cst_55 = arith.constant 1.280000e+02 : f32
    %185 = vector.broadcast %cst_55 : f32 to vector<8x1xf32>
    %186 = arith.divf %184, %185 : vector<8x1xf32>
    %cst_56 = arith.constant 9.99999974E-6 : f32
    %187 = vector.broadcast %cst_56 : f32 to vector<8x1xf32>
    %188 = arith.addf %186, %187 : vector<8x1xf32>
    %189 = math.rsqrt %188 : vector<8x1xf32>
    %190 = vector.broadcast %189 : vector<8x1xf32> to vector<8x128xf32>
    %191 = arith.mulf %181, %190 : vector<8x128xf32>
    %192 = arith.truncf %191 : vector<8x128xf32> to vector<8x128xbf16>
    %193 = vector.broadcast %180 : vector<1x128xbf16> to vector<8x128xbf16>
    %194 = arith.mulf %192, %193 : vector<8x128xbf16>
    %c0_57 = arith.constant 0 : index
    %c0_58 = arith.constant 0 : index
    %c0_59 = arith.constant 0 : index
    %195 = vector.load %arg9[%c0_57, %c0_58, %c0_59] : memref<1x128x512xbf16, #tpu.memory_space<vmem>>, vector<1x128x512xbf16>
    %196 = vector.shape_cast %195 : vector<1x128x512xbf16> to vector<128x512xbf16>
    %cst_60 = arith.constant dense<0.000000e+00> : vector<8x512xf32>
    %197 = tpu.matmul %194, %196, %cst_60 {dimension_numbers = #tpu.dot_dimension_numbers<[1], [0], [0], [1], [0, 0, 1, 1], [], []>} : vector<8x128xbf16>, vector<128x512xbf16>, vector<8x512xf32> -> vector<8x512xf32>
    %198 = vector.extract_strided_slice %197 {offsets = [0, 0], sizes = [8, 256], strides = [1, 1]} : vector<8x512xf32> to vector<8x256xf32>
    %199 = vector.extract_strided_slice %197 {offsets = [0, 256], sizes = [8, 256], strides = [1, 1]} : vector<8x512xf32> to vector<8x256xf32>
    %200 = arith.negf %198 : vector<8x256xf32>
    %201 = math.exp %200 : vector<8x256xf32>
    %cst_61 = arith.constant 1.000000e+00 : f32
    %202 = vector.broadcast %cst_61 : f32 to vector<8x256xf32>
    %203 = arith.addf %202, %201 : vector<8x256xf32>
    %204 = arith.divf %202, %203 : vector<8x256xf32>
    %205 = arith.mulf %198, %204 : vector<8x256xf32>
    %206 = arith.mulf %205, %199 : vector<8x256xf32>
    %207 = arith.truncf %206 : vector<8x256xf32> to vector<8x256xbf16>
    %c0_62 = arith.constant 0 : index
    %c0_63 = arith.constant 0 : index
    %c0_64 = arith.constant 0 : index
    %208 = vector.load %arg10[%c0_62, %c0_63, %c0_64] : memref<1x256x128xbf16, #tpu.memory_space<vmem>>, vector<1x256x128xbf16>
    %209 = vector.shape_cast %208 : vector<1x256x128xbf16> to vector<256x128xbf16>
    %cst_65 = arith.constant dense<0.000000e+00> : vector<8x128xf32>
    %210 = tpu.matmul %207, %209, %cst_65 {dimension_numbers = #tpu.dot_dimension_numbers<[1], [0], [0], [1], [0, 0, 1, 1], [], []>} : vector<8x256xbf16>, vector<256x128xbf16>, vector<8x128xf32> -> vector<8x128xf32>
    %211 = arith.truncf %210 : vector<8x128xf32> to vector<8x128xbf16>
    %212 = arith.addf %178, %211 : vector<8x128xbf16>
    %c0_66 = arith.constant 0 : index
    %c0_67 = arith.constant 0 : index
    %213 = vector.load %arg14[%c0_66, %c0_67] : memref<8x128xbf16, #tpu.memory_space<vmem>>, vector<8x128xbf16>
    tpu.vector_store %arg14[%c0_66, %c0_67], %212 {strides = array<i32>} : memref<8x128xbf16, #tpu.memory_space<vmem>>, vector<8x128xbf16>,
    %c1_i32 = arith.constant 1 : i32
    %214 = arith.cmpi eq, %arg1, %c1_i32 : i32
    %215 = arith.extui %214 : i1 to i32
    %c0_i32_68 = arith.constant 0 : i32
    %216 = arith.cmpi ne, %215, %c0_i32_68 : i32
    scf.if %216 {
      %c0_69 = arith.constant 0 : index
      %c0_70 = arith.constant 0 : index
      %217 = vector.load %arg11[%c0_69, %c0_70] : memref<1x128xbf16, #tpu.memory_space<vmem>>, vector<1x128xbf16>
      %218 = arith.extf %212 : vector<8x128xbf16> to vector<8x128xf32>
      %219 = arith.mulf %218, %218 : vector<8x128xf32>
      %cst_71 = arith.constant dense<0.000000e+00> : vector<8xf32>
      %220 = vector.multi_reduction <add>, %219, %cst_71 [1] : vector<8x128xf32> to vector<8xf32>
      %221 = vector.shape_cast %220 : vector<8xf32> to vector<8x1xf32>
      %cst_72 = arith.constant 1.280000e+02 : f32
      %222 = vector.broadcast %cst_72 : f32 to vector<8x1xf32>
      %223 = arith.divf %221, %222 : vector<8x1xf32>
      %cst_73 = arith.constant 9.99999974E-6 : f32
      %224 = vector.broadcast %cst_73 : f32 to vector<8x1xf32>
      %225 = arith.addf %223, %224 : vector<8x1xf32>
      %226 = math.rsqrt %225 : vector<8x1xf32>
      %227 = vector.broadcast %226 : vector<8x1xf32> to vector<8x128xf32>
      %228 = arith.mulf %218, %227 : vector<8x128xf32>
      %229 = arith.truncf %228 : vector<8x128xf32> to vector<8x128xbf16>
      %230 = vector.broadcast %217 : vector<1x128xbf16> to vector<8x128xbf16>
      %231 = arith.mulf %229, %230 : vector<8x128xbf16>
      %c0_74 = arith.constant 0 : index
      %c0_75 = arith.constant 0 : index
      %232 = vector.load %arg12[%c0_74, %c0_75] : memref<128x256xbf16, #tpu.memory_space<vmem>>, vector<128x256xbf16>
      %cst_76 = arith.constant dense<0.000000e+00> : vector<8x256xf32>
      %233 = tpu.matmul %231, %232, %cst_76 {dimension_numbers = #tpu.dot_dimension_numbers<[1], [0], [0], [1], [0, 0, 1, 1], [], []>} : vector<8x128xbf16>, vector<128x256xbf16>, vector<8x256xf32> -> vector<8x256xf32>
      %c0_77 = arith.constant 0 : index
      %c0_78 = arith.constant 0 : index
      %c0_79 = arith.constant 0 : index
      %234 = vector.load %arg13[%c0_77, %c0_78, %c0_79] : memref<1x8x256xf32, #tpu.memory_space<vmem>>, vector<1x8x256xf32>
      %235 = vector.shape_cast %234 : vector<1x8x256xf32> to vector<8x256xf32>
      %236 = vector.shape_cast %233 : vector<8x256xf32> to vector<1x8x256xf32>
      tpu.vector_store %arg13[%c0_77, %c0_78, %c0_79], %236 {strides = array<i32>} : memref<1x8x256xf32, #tpu.memory_space<vmem>>, vector<1x8x256xf32>,
    } else {
    }
    return
  }
  func.func @transform_0(%arg0: i32, %arg1: i32) -> (i32, i32, i32) {
    %c0_i32 = arith.constant 0 : i32
    %c0_i32_0 = arith.constant 0 : i32
    %c0_i32_1 = arith.constant 0 : i32
    return %arg0, %c0_i32, %c0_i32_0 : i32, i32, i32
  }
  func.func @transform_1(%arg0: i32, %arg1: i32) -> (i32, i32) {
    %c0_i32 = arith.constant 0 : i32
    %c0_i32_0 = arith.constant 0 : i32
    %c0_i32_1 = arith.constant 0 : i32
    return %c0_i32, %c0_i32_0 : i32, i32
  }
  func.func @transform_2(%arg0: i32, %arg1: i32) -> (i32, i32) {
    %c0_i32 = arith.constant 0 : i32
    %c0_i32_0 = arith.constant 0 : i32
    %c0_i32_1 = arith.constant 0 : i32
    return %c0_i32, %c0_i32_0 : i32, i32
  }
  func.func @transform_3(%arg0: i32, %arg1: i32) -> (i32, i32, i32) {
    %c0_i32 = arith.constant 0 : i32
    %c0_i32_0 = arith.constant 0 : i32
    %c0_i32_1 = arith.constant 0 : i32
    return %arg1, %c0_i32, %c0_i32_0 : i32, i32, i32
  }
  func.func @transform_4(%arg0: i32, %arg1: i32) -> (i32, i32, i32) {
    %c0_i32 = arith.constant 0 : i32
    %c0_i32_0 = arith.constant 0 : i32
    %c0_i32_1 = arith.constant 0 : i32
    return %arg1, %c0_i32, %c0_i32_0 : i32, i32, i32
  }
  func.func @transform_5(%arg0: i32, %arg1: i32) -> (i32, i32, i32) {
    %c0_i32 = arith.constant 0 : i32
    %c0_i32_0 = arith.constant 0 : i32
    %c0_i32_1 = arith.constant 0 : i32
    return %arg1, %c0_i32, %c0_i32_0 : i32, i32, i32
  }
  func.func @transform_6(%arg0: i32, %arg1: i32) -> (i32, i32, i32) {
    %c0_i32 = arith.constant 0 : i32
    %c0_i32_0 = arith.constant 0 : i32
    %c0_i32_1 = arith.constant 0 : i32
    return %arg1, %c0_i32, %c0_i32_0 : i32, i32, i32
  }
  func.func @transform_7(%arg0: i32, %arg1: i32) -> (i32, i32, i32) {
    %c0_i32 = arith.constant 0 : i32
    %c0_i32_0 = arith.constant 0 : i32
    %c0_i32_1 = arith.constant 0 : i32
    return %arg1, %c0_i32, %c0_i32_0 : i32, i32, i32
  }
  func.func @transform_8(%arg0: i32, %arg1: i32) -> (i32, i32, i32) {
    %c0_i32 = arith.constant 0 : i32
    %c0_i32_0 = arith.constant 0 : i32
    %c0_i32_1 = arith.constant 0 : i32
    return %arg1, %c0_i32, %c0_i32_0 : i32, i32, i32
  }
  func.func @transform_9(%arg0: i32, %arg1: i32) -> (i32, i32) {
    %c0_i32 = arith.constant 0 : i32
    %c0_i32_0 = arith.constant 0 : i32
    %c0_i32_1 = arith.constant 0 : i32
    return %c0_i32, %c0_i32_0 : i32, i32
  }
  func.func @transform_10(%arg0: i32, %arg1: i32) -> (i32, i32) {
    %c0_i32 = arith.constant 0 : i32
    %c0_i32_0 = arith.constant 0 : i32
    %c0_i32_1 = arith.constant 0 : i32
    return %c0_i32, %c0_i32_0 : i32, i32
  }
  func.func @transform_11(%arg0: i32, %arg1: i32) -> (i32, i32, i32) {
    %c0_i32 = arith.constant 0 : i32
    %c0_i32_0 = arith.constant 0 : i32
    %c0_i32_1 = arith.constant 0 : i32
    return %arg0, %c0_i32, %c0_i32_0 : i32, i32, i32
  }
}

</mosaic_0001>

<bundles_post_ra>
// kernel: llama2_forward.1
= control target key start
LH: loop header
LB: loop body
LE: loop exit
PB: predicated region body
PF: predicated region fallthrough
CT: control target
= control target key end

     0   :  { %s4156_s0 = inlined_call_operand.vmem [shape: bf16[2,8,128], index: 0, kind: input, shape index: {}]   ;;  %s4157_s1 = inlined_call_operand.vmem [shape: f32[8,32], index: 1, kind: input, shape index: {}]   ;;  %s4158_s2 = inlined_call_operand.vmem [shape: f32[8,32], index: 2, kind: input, shape index: {}]   ;;  %s4159_s3 = inlined_call_operand.vmem [shape: bf16[2,1,128], index: 3, kind: input, shape index: {}]   ;;  %s4160_s4 = inlined_call_operand.vmem [shape: bf16[2,1,128], index: 4, kind: input, shape index: {}]   ;;  %s4161_s5 = inlined_call_operand.hbm [shape: bf16[2,128,384], index: 5, kind: input, shape index: {}]   ;;  %s4162_s6 = inlined_call_operand.vmem [shape: bf16[2,128,128], index: 6, kind: input, shape index: {}]   ;;  %s4163_s7 = inlined_call_operand.hbm [shape: bf16[2,128,512], index: 7, kind: input, shape index: {}]   ;;  %s4164_s8 = inlined_call_operand.hbm [shape: bf16[2,256,128], index: 8, kind: input, shape index: {}]   ;;  %s4165_s9 = inlined_call_operand.vmem [shape: bf16[1,128], index: 9, kind: input, shape index: {}]   ;;  %s4166_s10 = inlined_call_operand.hbm [shape: bf16[128,256], index: 10, kind: input, shape index: {}]   ;;  %s4167_s11 = inlined_call_operand.hbm [shape: f32[2,8,256], index: 11, kind: output, shape index: {}]  }
   0x1   :  { %4189 = sst [smem:[#allocation27_spill]] %s4157_s1 }
   0x2   :  { %4190 = sst [smem:[#allocation28_spill]] %s4158_s2 }
   0x3   :  { %4191 = sst [smem:[#allocation29_spill]] %s4159_s3 }
   0x4   :  { %4192 = sst [smem:[#allocation30_spill]] %s4160_s4 }
   0x5   :  { %4193 = sst [smem:[#allocation31_spill]] %s4161_s5 }
   0x6   :  { %4194 = sst [smem:[#allocation32_spill]] %s4162_s6 }
   0x7   :  { %4195 = sst [smem:[#allocation33_spill]] %s4163_s7 }
   0x8   :  { %4196 = sst [smem:[#allocation34_spill]] %s4164_s8 }
   0x9   :  { %4197 = sst [smem:[#allocation35_spill]] %s4165_s9 }
   0xa   :  { %4198 = sst [smem:[#allocation36_spill]] %s4167_s11 }
   0xb   :  { %16 = vsyncpa [#allocation4], 0 }
   0xc   :  { %18 = vsyncpa [#allocation4 + $0x1], 0 }
   0xd   :  { %19 = vsyncpa [#allocation7], 0 }
   0xe   :  { %21 = vsyncpa [#allocation7 + $0x1], 0 }
   0xf   :  { %22 = vsyncpa [#allocation10], 0 }
  0x10   :  { %23 = vsyncpa [#allocation5], 0 }
  0x11   :  { %25 = vsyncpa [#allocation5 + $0x1], 0  ;;  %s3513_s17 = smov 0   ;;  %s3515_s18 = smov 0  }
  0x12   :  { %s3517_s19 = smov 0   ;;  %s3519_s20 = smov 0  }
  0x13   :  { %s3521_s21 = smov 0   ;;  %s3523_s22 = smov 0  }
  0x14   :  { %s3525_s23 = smov 0   ;;  %s3527_s24 = smov 0  }
  0x15   :  { %s3529_s25 = smov 0   ;;  %s3531_s26 = smov 0  }
  0x16   :  { %s3533_s27 = smov 0  }
  0x17 LB: > { %4199 = sst [smem:[#allocation16_spill]] %s3387_s17  ;;  %s40_s28 = sadd.s32 1, %s3419_s25  ;;  %s3427_s27 = sphi %s3533_s27, %s31_s27   ;;  %s3423_s26 = sphi %s3531_s26, %s4248_s26   ;;  %s3419_s25 = sphi %s3529_s25, %s4254_s25   ;;  %s3415_s24 = sphi %s3527_s24, %s4246_s24   ;;  %s3411_s23 = sphi %s3525_s23, %s4253_s23   ;;  %s3407_s22 = sphi %s3523_s22, %s4245_s22   ;;  %s3403_s21 = sphi %s3521_s21, %s4252_s21   ;;  %s3399_s20 = sphi %s3519_s20, %s4251_s20   ;;  %s3395_s19 = sphi %s3517_s19, %s4243_s19   ;;  %s3391_s18 = sphi %s3515_s18, %s4250_s18   ;;  %s3387_s17 = sphi %s3513_s17, %s4249_s17  }
  0x18   : > { %4200 = sst [smem:[#allocation17_spill]] %s3395_s19  ;;  %s43_s29 = sadd.s32 1, %s3423_s26 }
  0x19   : > { %4201 = sst [smem:[#allocation18_spill]] %s3407_s22  ;;  %p41_p0 = scmp.ge.s32.totalorder %s40_s28, 2 }
  0x1a   : > { %4202 = sst [smem:[#allocation19_spill]] %s3423_s26  ;;  %s170_s30 = sadd.s32 1, %s3407_s22 }
  0x1b   : > { %4203 = sst [smem:[#allocation20_spill]] %s3427_s27  ;;  %p177_p1 = scmp.ne.s32.totalorder %s3407_s22, %s3403_s21 }
  0x1c   : > { %p178_p2 = scmp.eq.s32.totalorder %s3427_s27, 0  ;;  %s4256_s28 = smov (%p41_p0, %s40_s28), 0 }
  0x1d   : > { %4204 = sst [smem:[#allocation21_spill]] %s4256_s28  ;;  %s4258_s29 = smov (!%p41_p0, %s43_s29), %s3423_s26 }
  0x1e   : > { %s167_s12 = ssub.s32 %s3419_s25, %s4256_s28  ;;  %p179_p3 = por %p178_p2, %p177_p1 }
  0x1f   : > { %p45_p4 = scmp.ge.s32.totalorder %s4258_s29, 2  ;;  %p168_p5 = scmp.eq.s32.totalorder %s167_s12, 0 }
  0x20   : > { %p2910_p6 = scmp.lt.s32.totalorder %s3427_s27, 4  ;;  %s3586_s14 = sand.u32 1, %s3407_s22  }
  0x21   : > { %s4260_s29 = smov (%p45_p4, %s4258_s29), 0  ;;  %s423_s16 = sand.u32 1, %s3427_s27  }
  0x22   : > { %4205 = sst [smem:[#allocation22_spill]] %s4260_s29  ;;  %p3588_p7 = pnand %p2910_p6, %p179_p3 }
  0x23   : > { %s3583_s13 = scalar_select %p168_p5, %s3407_s22, %s170_s30  }
  0x24   : > { %s4207_s15 = scalar_select %p3588_p7, 1, 0 }
  0x25   : > { %4206 = sst [smem:[#allocation23_spill]] %s3583_s13  ;;  %s2605_s11 = sshll.u32 %s3586_s14, 8 }
  0x26   : > { %s2736_s9 = sshll.u32 %s3419_s25, 12  ;;  %s4208_s7 = sld [smem:[#allocation33_spill]] }
  0x27   : > { %s427_s30 = scalar_lea.vmem [#allocation6], %s2605_s11  ;;  %s3602_s22 = scalar_lea.sflag [#allocation7], %s423_s16 }
  0x28   : > { %s434_s13 = sshll.u32 %s427_s30, 4  ;;  %p3608_p9 = pneg %p3588_p7  ;;  %s3600_s13 = int_to_ptr.vmem [resolvable:$true] %s434_s13 }
  0x2a   : > { %s4209_s6 = scalar_select %p3608_p9, 1, 0 }
  0x2c   : > { %s3598_s12 = scalar_lea.hbm %s4208_s7, %s2736_s9  ;;  %s3184_s11 = scalar_lea.hbm %s4208_s7, 8192 }
  0x2d   : > { %s3179_s1 = scalar_lea.hbm %s3598_s12, 4096  ;;  %p3185_p12 = scmp.lt.u32.totalorder %s3598_s12, %s4208_s7 }
  0x2e   : > { %p3180_p8 = scmp.ne.s32.totalorder %s3598_s12, %s3179_s1  ;;  %p3186_p13 = scmp.lt.u32.totalorder %s3184_s11, %s3179_s1 }
  0x2f   : > { %p3188_p1 = scmp.lt.u32.totalorder %s3179_s1, %s3598_s12 }
  0x30   : > { %p3182_p10 = pnand %p3608_p9, %p3180_p8  ;;  %p3187_p0 = por %p3186_p13, %p3185_p12 }
  0x32   : > { %p3183_p11 = pneg %p3182_p10  ;;  %p3189_p2 = por %p3188_p1, %p3187_p0 }
  0x34   : > { %p3190_p3 = pnand %p3189_p2, %p3183_p11 }
  0x36   : > { %3193 = shalt.err (!%p3190_p3)
}
  0x37   : > { %s3194_s16 = scalar_lea.vmem %s3600_s13, 4096  ;;  %s3429_s2 = smov [#allocation6]  }
  0x38   : > { %p3195_p4 = scmp.ne.s32.totalorder %s3600_s13, %s3194_s16  ;;  %s3199_s9 = sshll.u32 %s3429_s2, 4  ;;  %s3200_s9 = int_to_ptr.vmem [resolvable:$false] %s3199_s9 }
  0x39   : > { %s3201_s28 = scalar_lea.vmem %s3200_s9, 8192  ;;  %p3202_p8 = scmp.lt.s32.totalorder %s3600_s13, %s3200_s9 }
  0x3a   : > { %p3197_p5 = pnand %p3195_p4, %p3608_p9  ;;  %p3203_p10 = scmp.lt.s32.totalorder %s3201_s28, %s3194_s16 }
  0x3c   : > { %p3198_p6 = pneg %p3197_p5  ;;  %p3204_p12 = por %p3203_p10, %p3202_p8 }
  0x3e   : > { %p3205_p13 = pnand %p3204_p12, %p3198_p6 }
  0x40   : > { %3208 = shalt.err (!%p3205_p13)
}
  0x41   : > { %s3430_s1 = smov 256   ;;  %s3431_s11 = smov 16  }
  0x42   : > { %2901 = dma.hbm_to_vmem [thread:$0]  (!%p3588_p7), %s3598_s12, 4096, %s3600_s13, %s3602_s22, %s3430_s1, %s3430_s1, %s3431_s11  }
  0x43   : > { %s3633_s30 = sadd.s32 4294967295, %s3427_s27   ;;  %s2600_s16 = sadd.s32 4294967294, %s3427_s27  }
  0x44   : > { %p183_p11 = scmp.ne.s32.totalorder %s3403_s21, %s3399_s20  ;;  %p4178_p0 = scmp.eq.s32.totalorder %s3633_s30, 0 }
  0x45   : > { %s313_s2 = ssub.s32 %s3423_s26, %s4260_s29  ;;  %s316_s9 = sadd.s32 1, %s3395_s19 }
  0x46   : > { %p314_p1 = scmp.eq.s32.totalorder %s313_s2, 0  ;;  %p3644_p2 = por %p4178_p0, %p183_p11 }
  0x47   : > { %p326_p3 = scmp.ne.s32.totalorder %s3395_s19, %s3391_s18  ;;  %p327_p4 = scmp.eq.s32.totalorder %s3633_s30, 3 }
  0x48   : > { %s4210_s28 = scalar_select %p3644_p2, 1, 0 }
  0x49   : > { %s3651_s13 = scalar_select %p314_p1, %s3395_s19, %s316_s9  }
  0x4a   : > { %p332_p5 = scmp.ne.s32.totalorder %s3391_s18, %s3387_s17  ;;  %p333_p6 = scmp.eq.s32.totalorder %s2600_s16, 3 }
  0x4b   : > { %4211 = sst [smem:[#allocation24_spill]] %s3651_s13  ;;  %p2601_p8 = scmp.ge.s32.totalorder %s3427_s27, 1 }
  0x4c   : > { %p3657_p10 = por %p327_p4, %p326_p3  ;;  %p340_p12 = scmp.lt.s32.totalorder %s3427_s27, 5 }
  0x4d   : > { %p3662_p13 = por %p333_p6, %p332_p5  ;;  %s3432_s11 = smov [#allocation9]  }
  0x4e   : > { %s4212_s20 = scalar_select %p3657_p10, 1, 0 }
  0x4f   : > { %s4214_s12 = scalar_select %p3662_p13, 1, 0 }
  0x50   : > { %4213 = sst [smem:[#allocation25_spill]] %s4212_s20  ;;  %p3666_p11 = pnand %p2601_p8, %p340_p12 }
  0x51   : > { %4215 = sst [smem:[#allocation26_spill]] %s4214_s12  ;;  %s361_s2 = sshll.u32 %s3432_s11, 4  ;;  %s362_s2 = int_to_ptr.vmem [resolvable:$true] %s361_s2 }
  0x52   : > { %s4216_s1 = scalar_select %p3666_p11, 1, 0 }
  0x53   : > { %p2891_p1 = pneg %p3666_p11  ;;  %s2876_s9 = smul.u32 192, %s3586_s14 }
  0x54   : > { %s2877_s7 = smul.u32 3072, %s3419_s25  ;;  %s3209_s13 = scalar_lea.hbm %s4166_s10, 2048 }
  0x55   : > { %p3674_p3 = pnand %p2891_p1, %p4178_p0  ;;  %p3210_p4 = scmp.ne.s32.totalorder %s4166_s10, %s3209_s13 }
  0x56   : > { %p3216_p12 = scmp.lt.u32.totalorder %s3209_s13, %s4166_s10 }
  0x57   : > { %p3211_p5 = pneg %p3674_p3 }
  0x59   : > { %p3212_p6 = pnand %p3211_p5, %p3210_p4 }
  0x5b   : > { %p3213_p8 = pneg %p3212_p6 }
  0x5d   : > { %p3218_p1 = pnand %p3216_p12, %p3213_p8 }
  0x5f   : > { %3221 = shalt.err (!%p3218_p1)
}
  0x60   : > { %s3222_s27 = scalar_lea.vmem %s362_s2, 2048  ;;  %p3230_p2 = scmp.lt.s32.totalorder %s362_s2, %s362_s2 }
  0x61   : > { %p3223_p0 = scmp.ne.s32.totalorder %s362_s2, %s3222_s27  ;;  %p3231_p11 = scmp.lt.s32.totalorder %s3222_s27, %s3222_s27 }
  0x63   : > { %p3225_p13 = pnand %p3223_p0, %p3211_p5  ;;  %p3232_p7 = por %p3231_p11, %p3230_p2 }
  0x65   : > { %p3226_p10 = pneg %p3225_p13 }
  0x67   : > { %p3233_p9 = pnand %p3232_p7, %p3226_p10 }
  0x69   : > { %3236 = shalt.err (!%p3233_p9)
}
  0x6a   : > { %s3433_s19 = smov 128   ;;  %s3434_s26 = smov 8  }
  0x6b   : > { %2894 = dma.hbm_to_vmem [thread:$0]  (!%p3674_p3), %s4166_s10, 2048, %s362_s2, [#allocation10], %s3433_s19, %s3433_s19, %s3434_s26  }
  0x6c   : > { %s4218_s5 = sld [smem:[#allocation31_spill]]  ;;  %s398_s27 = scalar_lea.vmem [#allocation3], %s2876_s9 }
  0x6d   : > { %s405_s20 = sshll.u32 %s398_s27, 4  ;;  %s395_s4 = scalar_lea.sflag [#allocation4], %s3586_s14  ;;  %s3701_s20 = int_to_ptr.vmem [resolvable:$true] %s405_s20 }
  0x6e   : > { %p4219_p9 = scmp.ne.s32.totalorder %s4209_s6, 0 }
  0x72   : > { %s3699_s11 = scalar_lea.hbm %s4218_s5, %s2877_s7  ;;  %s3242_s19 = scalar_lea.hbm %s4218_s5, 6144 }
  0x73   : > { %s3237_s3 = scalar_lea.hbm %s3699_s11, 3072  ;;  %p3243_p10 = scmp.lt.u32.totalorder %s3699_s11, %s4218_s5 }
  0x74   : > { %p3238_p7 = scmp.ne.s32.totalorder %s3699_s11, %s3237_s3  ;;  %p3244_p13 = scmp.lt.u32.totalorder %s3242_s19, %s3237_s3 }
  0x75   : > { %p3246_p3 = scmp.lt.u32.totalorder %s3237_s3, %s3699_s11 }
  0x76   : > { %p3240_p0 = pnand %p3238_p7, %p4219_p9  ;;  %p3245_p11 = por %p3244_p13, %p3243_p10 }
  0x78   : > { %p3241_p2 = pneg %p3240_p0  ;;  %p3247_p4 = por %p3246_p3, %p3245_p11 }
  0x7a   : > { %p3248_p5 = pnand %p3247_p4, %p3241_p2 }
  0x7c   : > { %3251 = shalt.err (!%p3248_p5)
}
  0x7d   : > { %s3252_s9 = scalar_lea.vmem %s3701_s20, 3072  ;;  %s3435_s29 = smov [#allocation3]  }
  0x7e   : > { %p3253_p6 = scmp.ne.s32.totalorder %s3701_s20, %s3252_s9  ;;  %s3257_s17 = sshll.u32 %s3435_s29, 4  ;;  %s3258_s17 = int_to_ptr.vmem [resolvable:$false] %s3257_s17 }
  0x7f   : > { %s3259_s13 = scalar_lea.vmem %s3258_s17, 6144  ;;  %p3260_p1 = scmp.lt.s32.totalorder %s3701_s20, %s3258_s17 }
  0x80   : > { %p3255_p8 = pnand %p3253_p6, %p4219_p9  ;;  %p3261_p7 = scmp.lt.s32.totalorder %s3259_s13, %s3252_s9 }
  0x82   : > { %p3256_p12 = pneg %p3255_p8  ;;  %p3262_p0 = por %p3261_p7, %p3260_p1 }
  0x84   : > { %p3263_p10 = pnand %p3262_p0, %p3256_p12 }
  0x86   : > { %3266 = shalt.err (!%p3263_p10)
}
  0x87   : > { %s3436_s3 = smov 192   ;;  %s3437_s12 = smov 12  }
  0x88   : > { %p4220_p2 = scmp.ne.s32.totalorder %s4207_s15, 0  ;;  %s2608_s27 = sshll.u32 %s3586_s14, 7 }
  0x89   : > { %s2737_s2 = sshll.u32 %s3419_s25, 11  ;;  %s4221_s8 = sld [smem:[#allocation34_spill]] }
  0x8a   : > { %2898 = dma.hbm_to_vmem [thread:$0]  (!%p4220_p2), %s3699_s11, 3072, %s3701_s20, %s395_s4, %s3436_s3, %s3436_s3, %s3437_s12  }
  0x8b   : > { %s448_s26 = scalar_lea.vmem [#allocation8], %s2608_s27 }
  0x8c   : > { %s455_s9 = sshll.u32 %s448_s26, 4  ;;  %s3734_s9 = int_to_ptr.vmem [resolvable:$true] %s455_s9 }
  0x8f   : > { %s3732_s7 = scalar_lea.hbm %s4221_s8, %s2737_s2  ;;  %s3272_s20 = scalar_lea.hbm %s4221_s8, 4096 }
  0x90   : > { %s3267_s29 = scalar_lea.hbm %s3732_s7, 2048  ;;  %p3273_p4 = scmp.lt.u32.totalorder %s3732_s7, %s4221_s8 }
  0x91   : > { %p3268_p13 = scmp.ne.s32.totalorder %s3732_s7, %s3267_s29  ;;  %p3274_p5 = scmp.lt.u32.totalorder %s3272_s20, %s3267_s29 }
  0x92   : > { %p3276_p8 = scmp.lt.u32.totalorder %s3267_s29, %s3732_s7 }
  0x93   : > { %p3270_p11 = pnand %p3268_p13, %p4219_p9  ;;  %p3275_p6 = por %p3274_p5, %p3273_p4 }
  0x95   : > { %p3271_p3 = pneg %p3270_p11  ;;  %p3277_p12 = por %p3276_p8, %p3275_p6 }
  0x97   : > { %p3278_p1 = pnand %p3277_p12, %p3271_p3 }
  0x99   : > { %3281 = shalt.err (!%p3278_p1)
}
  0x9a   : > { %s3282_s13 = scalar_lea.vmem %s3734_s9, 2048  ;;  %s3438_s3 = smov [#allocation8]  }
  0x9b   : > { %p3283_p7 = scmp.ne.s32.totalorder %s3734_s9, %s3282_s13  ;;  %s3287_s12 = sshll.u32 %s3438_s3, 4  ;;  %s3288_s12 = int_to_ptr.vmem [resolvable:$false] %s3287_s12 }
  0x9c   : > { %s3289_s27 = scalar_lea.vmem %s3288_s12, 4096  ;;  %p3290_p13 = scmp.lt.s32.totalorder %s3734_s9, %s3288_s12 }
  0x9d   : > { %p3285_p0 = pnand %p3283_p7, %p4219_p9  ;;  %p3291_p11 = scmp.lt.s32.totalorder %s3289_s27, %s3282_s13 }
  0x9f   : > { %p3286_p10 = pneg %p3285_p0  ;;  %p3292_p4 = por %p3291_p11, %p3290_p13 }
  0xa1   : > { %p3293_p5 = pnand %p3292_p4, %p3286_p10 }
  0xa3   : > { %3296 = shalt.err (!%p3293_p5)
}
  0xa4   : > { %s3439_s2 = smov 64   ;;  %s3440_s16 = smov 4  }
  0xa5   : > { %2904 = dma.hbm_to_vmem [thread:$0]  (!%p4220_p2), %s3732_s7, 2048, %s3734_s9, %s3602_s22, %s3439_s2, %s3439_s2, %s3440_s16  }
  0xa6   : > { %p4222_p9 = scmp.ne.s32.totalorder %s4216_s1, 0 }
  0xa7   : > { %s469_s6 = sand.u32 (!%p4222_p9), 1, %s3403_s21   ;;  %p4223_p3 = scmp.ne.s32.totalorder (!%p4222_p9), %s4210_s28, 0 }
  0xa8   : > { %467 = sbr.rel (%p4222_p9) target bundleno = 3113 (0xc29), region = 64  ;;  %s470_s26 = scalar_lea.sflag (!%p4222_p9), [#allocation4], %s469_s6 }
  0xa9   : > { %s2878_s19 = smul.u32 (!%p4222_p9), 192, %s469_s6 }
  0xab   : > { %s3761_s29 = scalar_lea.vmem (!%p4222_p9), [#allocation3], %s2878_s19 }
  0xaf   : > { %3370 = dma.done.wait (%p4223_p3), %s470_s26, 3072  }
  0xb0   : > { %3372 = vsyncadd (%p4223_p3), %s470_s26, 4294964224  ;;  %s478_s4 = sand.u32 1, %s3633_s30   ;;  %s2612_s15 = sshll.u32 %s469_s6, 8 }
  0xb1   : > { %s479_s22 = scalar_lea.sflag [#allocation7], %s478_s4  ;;  %s3768_s7 = scalar_lea.vmem [#allocation6], %s2612_s15 }
  0xb2   : > { %3374 = dma.done.wait (%p4223_p3), %s479_s22, 6144  }
  0xb3   : > { %3376 = vsyncadd (%p4223_p3), %s479_s22, 4294961152  ;;  %s2613_s1 = sshll.u32 %s469_s6, 7  ;;  %p4224_p2 = scmp.eq.s32.totalorder %s3633_s30, 0 }
  0xb4   : > { %s3774_s9 = scalar_lea.vmem [#allocation8], %s2613_s1 }
  0xb5   : > { %3378 = dma.done.wait (%p4224_p2), [#allocation10], 2048   ;;  %p4225_p6 = pmov %p4224_p2 }
  0xb6   : > { %s4188_s14 = sand.u32 1, %s3391_s18   ;;  %p559_p8 = scmp.lt.s32.totalorder %s3415_s24, 1 }
  0xb7   : > { %3380 = vsyncadd (%p4225_p6), [#allocation10], 4294965248  ;;  %s2615_s28 = sshll.u32 %s4188_s14, 4  ;;  %p563_p12 = scmp.lt.s32.totalorder %s3411_s23, 1 }
  0xb8   : > { %s560_s20 = scalar_select %p559_p8, %s3415_s24, 1 }
  0xb9   : > { %s3787_s11 = scalar_select %p563_p12, %s3411_s23, 1 }
  0xba   : > { %s2616_s17 = sshll.u32 %s560_s20, 2  ;;  %s4226_s2 = sld [smem:[#allocation29_spill]] }
  0xbb   : > { %s562_s3 = scalar_lea.vmem %s4156_s0, %s2616_s17  ;;  %s4227_s26 = sld [smem:[#allocation30_spill]] }
  0xbc   : > { %s2738_s15 = sshll.u32 %s3787_s11, 6  ;;  %s4228_s14 = sld [smem:[#allocation32_spill]] }
  0xbd   : > { %s3806_s8 = scalar_lea.vmem [#allocation11], %s2615_s28  ;;  %p2619_p1 = scmp.ne.s32.totalorder %s3411_s23, 0 }
  0xbe   : > { %v579_v0 = vld [vmem:[%s562_s3] sm:$0xf] (!%p2619_p1) }
  0xbf   : > { %578 = sbr.rel (%p2619_p1) target bundleno = 198 (0xc6), region = 84  ;;  %580 = vst [vmem:[#allocation2] sm:$0xf] (!%p2619_p1), %v579_v0 }
  0xc0   : > { %s565_s16 = scalar_lea.vmem %s4226_s2, %s3787_s11 }
  0xc1   : > { %s568_s4 = scalar_lea.vmem %s4227_s26, %s3787_s11 }
  0xc2   : > { %s3804_s5 = scalar_lea.vmem %s4228_s14, %s2738_s15 }
  0xc6 PF: > { %v3809_v1 = vld [vmem:[#allocation2] sm:$0xf]  ;;  %v3021_v3 = vld [vmem:[%s3761_s29 + $0x4] ss:$12 sps:$4 sm:$0xff]   ;;  %v3441_v4 = vmov 0.0   ;;  %v3442_v26 = vmov 0   ;;  %v596_v33 = vlaneseq }
  0xc7   : > { %v3812_v2 = vunpack.c.l.bf16 %v3809_v1  ;;  %2796 = vmatprep.subr.bf16.mxu1 %v3441_v4  ;;  %v3023_v5 = vld [vmem:[%s3761_s29] ss:$12 sps:$4 sm:$0xff]   ;;  %v3024_v6 = vld [vmem:[%s3761_s29 + $0x8] ss:$12 sps:$4 sm:$0xff]   ;;  %761 = vmatprep.subr.bf16.mxu0 %v3021_v3  ;;  %v3027_v9 = vld [vmem:[%s3761_s29 + $0x18] ss:$12 sps:$4 sm:$0xff]  }
  0xc8   : > { %v3025_v8 = vld [vmem:[%s3761_s29 + $0x1c] ss:$12 sps:$4 sm:$0xff]   ;;  %762 = vmatpush1.bf16.msra.mxu0 %v3023_v5  ;;  %2797 = vmatpush3.bf16.msra.mxu1 %v3024_v6  ;;  %v3028_v10 = vld [vmem:[%s3761_s29 + $0x20] ss:$12 sps:$4 sm:$0xff]   ;;  %v3032_v13 = vld [vmem:[%s3761_s29 + $0x38] ss:$12 sps:$4 sm:$0xff]  }
  0xc9   : > { %v584_v7 = vmul.f32 %v3812_v2, %v3812_v2  ;;  %763 = vmatprep.subr.bf16.mxu0 %v3025_v8  ;;  %v3029_v11 = vld [vmem:[%s3761_s29 + $0x34] ss:$12 sps:$4 sm:$0xff]   ;;  %2798 = vmatprep.subr.bf16.mxu1 %v3441_v4  ;;  %v3031_v12 = vld [vmem:[%s3761_s29 + $0x30] ss:$12 sps:$4 sm:$0xff]   ;;  %v3033_v14 = vld [vmem:[%s3761_s29 + $0x4c] ss:$12 sps:$4 sm:$0xff]  }
  0xca   : > { %v3035_v15 = vld [vmem:[%s3761_s29 + $0x48] ss:$12 sps:$4 sm:$0xff]   ;;  %v3036_v16 = vld [vmem:[%s3761_s29 + $0x50] ss:$12 sps:$4 sm:$0xff]   ;;  %v3039_v18 = vld [vmem:[%s3761_s29 + $0x60] ss:$12 sps:$4 sm:$0xff]   ;;  %793 = vmatprep.mubr.bf16.mxu0 %v3442_v26 }
  0xcb   : > { %585 = vadd.xlane.f32.xlu0 %v584_v7  ;;  %v3037_v17 = vld [vmem:[%s3761_s29 + $0x64] ss:$12 sps:$4 sm:$0xff]   ;;  %v3040_v19 = vld [vmem:[%s3761_s29 + $0x68] ss:$12 sps:$4 sm:$0xff]   ;;  %v3044_v22 = vld [vmem:[%s3761_s29 + $0x80] ss:$12 sps:$4 sm:$0xff]  }
  0xcc   : > { %764 = vmatpush1.bf16.msra.mxu0 %v3027_v9  ;;  %2799 = vmatpush3.bf16.msra.mxu1 %v3028_v10  ;;  %v3041_v20 = vld [vmem:[%s3761_s29 + $0x7c] ss:$12 sps:$4 sm:$0xff]   ;;  %v3043_v21 = vld [vmem:[%s3761_s29 + $0x78] ss:$12 sps:$4 sm:$0xff]   ;;  %v3045_v23 = vld [vmem:[%s3761_s29 + $0x94] ss:$12 sps:$4 sm:$0xff]  }
  0xcd   : > { %765 = vmatprep.subr.bf16.mxu0 %v3029_v11  ;;  %2800 = vmatprep.subr.bf16.mxu1 %v3441_v4  ;;  %v3047_v24 = vld [vmem:[%s3761_s29 + $0x90] ss:$12 sps:$4 sm:$0xff]   ;;  %v3048_v25 = vld [vmem:[%s3761_s29 + $0x98] ss:$12 sps:$4 sm:$0xff]   ;;  %vm3443_vm0 = vmmov 0   ;;  %v3854_v34 = vshrl.u32 %v596_v33, 7 }
  0xce   : > { %2812 = vmatprep.mubr.msk.bf16.mxu1 %vm3443_vm0, %v3441_v4  ;;  %v3049_v27 = vld [vmem:[%s3761_s29 + $0xac] ss:$12 sps:$4 sm:$0xff]   ;;  %v3051_v28 = vld [vmem:[%s3761_s29 + $0xa8] ss:$12 sps:$4 sm:$0xff]   ;;  %v3052_v29 = vld [vmem:[%s3761_s29 + $0xb0] ss:$12 sps:$4 sm:$0xff]  }
  0xcf   : > { %v582_v35 = vld [vmem:[%s565_s16] sm:$0x1]  ;;  %v3862_v37 = vsub.s32 0, %v3854_v34  ;;  %s3444_s20 = smov 112   ;;  %s3445_s17 = smov 80   ;;  %vm858_vm1 = vcmask 130048  }
  0xd0   : > { %766 = vmatpush1.bf16.msra.mxu0 %v3031_v12  ;;  %2801 = vmatpush3.bf16.msra.mxu1 %v3032_v13  ;;  %v594_v36 = vpack.i.b16 %v582_v35, %v582_v35  ;;  %s3446_s30 = smov 16   ;;  %s4230_s12 = sld [smem:[#allocation27_spill]]  ;;  %vm876_vm2 = vcmask 261120   ;;  %vm955_vm4 = vcmask 64512   ;;  %vm1655_vm5 = vcmask 523264  }
  0xd1   : > { %2802 = vmatprep.subr.bf16.mxu1 %v3441_v4  ;;  %767 = vmatprep.subr.bf16.mxu0 %v3033_v14  ;;  %s3447_s27 = smov 32   ;;  %s3448_s2 = smov 48   ;;  %vm1657_vm6 = vcmask 785408  }
  0xd2   : > { %v599_v40 = vrot.slane %v594_v36, %v3862_v37  ;;  %s3449_s16 = smov 64   ;;  %s4231_s26 = sld [smem:[#allocation28_spill]] }
  0xd3   : > { %s3450_s15 = smov 96   ;;  %p2714_p7 = scmp.ne.s32.totalorder %s3411_s23, 1 }
  0xd4   : > { %768 = vmatpush1.bf16.msra.mxu0 %v3035_v15  ;;  %2803 = vmatpush3.bf16.msra.mxu1 %v3036_v16 }
  0xd5   : > { %2804 = vmatprep.subr.bf16.mxu1 %v3441_v4  ;;  %769 = vmatprep.subr.bf16.mxu0 %v3037_v17 }
  0xd6   : > { %v3890_v53 = vld [vmem:[%s4230_s12] sm:$0xff] }
  0xd8   : > { %770 = vmatpush1.bf16.msra.mxu0 %v3039_v18  ;;  %2805 = vmatpush3.bf16.msra.mxu1 %v3040_v19  ;;  %v3902_v58 = vld [vmem:[%s4231_s26] sm:$0xff] }
  0xd9   : > { %771 = vmatprep.subr.bf16.mxu0 %v3041_v20  ;;  %2806 = vmatprep.subr.bf16.mxu1 %v3441_v4 }
  0xdc   : > { %772 = vmatpush1.bf16.msra.mxu0 %v3043_v21  ;;  %2807 = vmatpush3.bf16.msra.mxu1 %v3044_v22 }
  0xdd   : > { %773 = vmatprep.subr.bf16.mxu0 %v3045_v23  ;;  %2808 = vmatprep.subr.bf16.mxu1 %v3441_v4 }
  0xe0   : > { %774 = vmatpush1.bf16.msra.mxu0 %v3047_v24  ;;  %2809 = vmatpush3.bf16.msra.mxu1 %v3048_v25 }
  0xe1   : > { %775 = vmatprep.subr.bf16.mxu0 %v3049_v27  ;;  %2810 = vmatprep.subr.bf16.mxu1 %v3441_v4 }
  0xe4   : > { %776 = vmatpush1.bf16.msra.mxu0 %v3051_v28  ;;  %2811 = vmatpush3.bf16.msra.mxu1 %v3052_v29 }
  0xe5   : > { %2821 = vmatprep.subr.mxu1 %v3441_v4  ;;  %2816 = vmatprep.subr.mxu0 %v3441_v4 }
 0x158   : > { %v586_v30 = vpop.xlane.xlu0 %585 }
 0x159   : > { %v588_v31 = vmul.f32 0.0078125, %v586_v30 }
 0x15b   : > { %v589_v32 = vadd.f32 1e-05, %v588_v31 }
 0x15d   : > { %3125 = vrsqrt.f32 %v589_v32 }
 0x167   : > { %v3126_v38 = vpop.eup %3125 }
 0x168   : > { %v591_v39 = vmul.f32 %v3126_v38, %v3812_v2 }
 0x16a   : > { %v592_v41 = vpack.c.bf16 %v591_v39, %v591_v39 }
 0x16c   : > { %v600_v42 = vmul.bf16 %v599_v40, %v592_v41 }
 0x16e   : > { %794 = vmatmul.mubr.bf16.vlgmr.msra.gmra.mrb[0].mxu0 %v600_v42  ;;  %2813 = vmatmul.mubr.bf16.vlgmr.msra.gmra.mrb[0].mxu1 %v600_v42 }
 0x16f   : > { %2818 = vmatprep.mubr.msk.f32.mxu0 %vm3443_vm0, %v3441_v4  ;;  %2823 = vmatprep.mubr.msk.f32.mxu1 %vm3443_vm0, %v3441_v4 }
 0x241   : > { %v3870_v43 = vpop.f32.mrb[0].mxu0  ;;  %v3872_v44 = vpop.f32.mrb[0].mxu1 }
 0x242   : > { %v3874_v45 = vpop.f32.mrb[1].mxu0  ;;  %v2814_v46 = vpop.f32.mrb[1].mxu1  ;;  %2822 = vmatpush3.msra.mxu1 %v3872_v44  ;;  %v849_v52 = vsub.f32 0.0, %v3870_v43 }
 0x243   : > { %v839_v47 = vpop.f32.mrb[2].mxu1  ;;  %1061 = vrot.lane.b32.xlu1 %v3874_v45, %s3444_s20  ;;  %v799_v48 = vpop.f32.mrb[2].mxu0  ;;  %v863_v49 = vsub.f32 0.0, %v3874_v45  ;;  %2831 = vmatprep.subr.mxu1 %v3441_v4 }
 0x244   : > { %v800_v50 = vpop.f32.mrb[3].mxu0  ;;  %v2815_v51 = vpop.f32.mrb[3].mxu1  ;;  %v873_v48 = vmul.f32 %v3890_v53, %v3874_v45 }
 0x245   : > { %1058 = vrot.lane.b32.xlu0 %v863_v49, %s3445_s17 }
 0x247   : > { %1040 = vrot.lane.b32.xlu1 %v849_v52, %s3445_s17 }
 0x249   : > { %1459 = vrot.lane.b32.xlu0 %v863_v49, %s3446_s30 }
 0x24b   : > { %1043 = vrot.lane.b32.xlu1 %v3870_v43, %s3444_s20 }
 0x24d   : > { %1442 = vrot.lane.b32.xlu0 %v849_v52, %s3446_s30 }
 0x24f   : > { %1262 = vrot.lane.b32.xlu1 %v3874_v45, %s3445_s17 }
 0x251   : > { %1048 = vrot.lane.b32.xlu0 %v3890_v53, %s3447_s27 }
 0x253   : > { %1242 = vrot.lane.b32.xlu1 %v849_v52, %s3448_s2 }
 0x255   : > { %1249 = vrot.lane.b32.xlu0 %v3890_v53, %s3449_s16 }
 0x257   : > { %1245 = vrot.lane.b32.xlu1 %v3870_v43, %s3445_s17 }
 0x25b   : > { %1259 = vrot.lane.b32.xlu1 %v863_v49, %s3448_s2 }
 0x25f   : > { %1462 = vrot.lane.b32.xlu1 %v3874_v45, %s3448_s2 }
 0x263   : > { %1445 = vrot.lane.b32.xlu1 %v3870_v43, %s3448_s2 }
 0x2b5   : > { %v1062_v54 = vpop.permute.xlu1 %1061 }
 0x2b7   : > { %v1059_v56 = vpop.permute.xlu0 %1058 }
 0x2b8   : > { %v1064_v61 = vsel %vm858_vm1, %v1059_v56, %v1062_v54 }
 0x2b9   : > { %v1041_v55 = vpop.permute.xlu1 %1040  ;;  %v1066_v63 = vmul.f32 %v1064_v61, %v3902_v58  ;;  %v847_v61 = vand.u32 127, %v596_v33 }
 0x2bb   : > { %v1460_v6 = vpop.permute.xlu0 %1459  ;;  %vm848_vm3 = vcmp.le.s32.totalorder %v847_v61, %v3854_v34 }
 0x2bd   : > { %v1044_v57 = vpop.permute.xlu1 %1043 }
 0x2be   : > { %v1046_v59 = vsel %vm858_vm1, %v1041_v55, %v1044_v57  ;;  %v860_v55 = vmul.f32 %v3890_v53, %v3870_v43 }
 0x2bf   : > { %v1052_v60 = vmul.f32 %v1046_v59, %v3902_v58  ;;  %v1443_v13 = vpop.permute.xlu0 %1442 }
 0x2c1   : > { %v1263_v62 = vpop.permute.xlu1 %1262  ;;  %1054 = vrot.lane.b32.xlu1 %v1052_v60, %s3447_s27 }
 0x2c3   : > { %v1049_v17 = vpop.permute.xlu0 %1048 }
 0x2c4   : > { %v1051_v18 = vmul.f32 %v1049_v17, %v3870_v43  ;;  %v1065_v21 = vmul.f32 %v1049_v17, %v3874_v45 }
 0x2c5   : > { %v1243_v0 = vpop.permute.xlu1 %1242  ;;  %1068 = vrot.lane.b32.xlu1 %v1066_v63, %s3447_s27 }
 0x2c7   : > { %v1250_v24 = vpop.permute.xlu0 %1249 }
 0x2c8   : > { %v1266_v25 = vmul.f32 %v1250_v24, %v3874_v45  ;;  %v1252_v30 = vmul.f32 %v1250_v24, %v3870_v43 }
 0x2c9   : > { %v1246_v2 = vpop.permute.xlu1 %1245  ;;  %1449 = vrot.lane.b32.xlu1 %v3890_v53, %s3450_s15 }
 0x2ca   : > { %v1248_v8 = vsel %vm858_vm1, %v1243_v0, %v1246_v2 }
 0x2cb   : > { %v1253_v11 = vmul.f32 %v1248_v8, %v3902_v58 }
 0x2cd   : > { %v1260_v3 = vpop.permute.xlu1 %1259 }
 0x2ce   : > { %v1265_v5 = vsel %vm858_vm1, %v1260_v3, %v1263_v62 }
 0x2cf   : > { %v1267_v7 = vmul.f32 %v1265_v5, %v3902_v58 }
 0x2d1   : > { %v1463_v9 = vpop.permute.xlu1 %1462  ;;  %1269 = vrot.lane.b32.xlu0 %v1267_v7, %s3449_s16 }
 0x2d2   : > { %v1465_v10 = vsel %vm858_vm1, %v1460_v6, %v1463_v9 }
 0x2d3   : > { %v1467_v12 = vmul.f32 %v1465_v10, %v3902_v58 }
 0x2d5   : > { %v1446_v14 = vpop.permute.xlu1 %1445  ;;  %1255 = vrot.lane.b32.xlu0 %v1253_v11, %s3449_s16  ;;  %1469 = vrot.lane.b32.xlu1 %v1467_v12, %s3450_s15 }
 0x2d6   : > { %v1448_v15 = vsel %vm858_vm1, %v1443_v13, %v1446_v14 }
 0x2d7   : > { %v1453_v16 = vmul.f32 %v1448_v15, %v3902_v58 }
 0x2d9   : > { %865 = vrot.lane.b32.xlu1 %v863_v49, %s3444_s20  ;;  %1455 = vrot.lane.b32.xlu0 %v1453_v16, %s3450_s15 }
 0x2dd   : > { %851 = vrot.lane.b32.xlu1 %v849_v52, %s3444_s20  ;;  %869 = vrot.lane.b32.xlu0 %v3874_v45, %s3446_s30 }
 0x2e1   : > { %855 = vrot.lane.b32.xlu0 %v3870_v43, %s3446_s30 }
 0x333   : > { %v1055_v19 = vpop.permute.xlu1 %1054 }
 0x334   : > { %v1057_v20 = vadd.f32 %v1055_v19, %v1051_v18 }
 0x336   : > { %1073 = vrot.lane.b32.xlu0 %v1057_v20, %s3450_s15 }
 0x337   : > { %v1069_v22 = vpop.permute.xlu1 %1068 }
 0x338   : > { %v1071_v23 = vadd.f32 %v1069_v22, %v1065_v21 }
 0x33a   : > { %1076 = vrot.lane.b32.xlu1 %v1071_v23, %s3450_s15 }
 0x33b   : > { %v1450_v27 = vpop.permute.xlu1 %1449 }
 0x33c   : > { %v1466_v31 = vmul.f32 %v1450_v27, %v3874_v45  ;;  %v1452_v39 = vmul.f32 %v1450_v27, %v3870_v43 }
 0x343   : > { %v1270_v28 = vpop.permute.xlu0 %1269 }
 0x344   : > { %v1272_v29 = vadd.f32 %v1270_v28, %v1266_v25 }
 0x346   : > { %1277 = vrot.lane.b32.xlu1 %v1272_v29, %s3449_s16 }
 0x347   : > { %v1470_v32 = vpop.permute.xlu1 %1469  ;;  %v1256_v35 = vpop.permute.xlu0 %1255 }
 0x348   : > { %v1472_v36 = vadd.f32 %v1470_v32, %v1466_v31  ;;  %v1258_v38 = vadd.f32 %v1256_v35, %v1252_v30 }
 0x34a   : > { %1477 = vrot.lane.b32.xlu1 %v1472_v36, %s3447_s27  ;;  %1274 = vrot.lane.b32.xlu0 %v1258_v38, %s3449_s16 }
 0x34b   : > { %v1456_v40 = vpop.permute.xlu0 %1455  ;;  %v866_v42 = vpop.permute.xlu1 %865 }
 0x34c   : > { %v1458_v41 = vadd.f32 %v1456_v40, %v1452_v39 }
 0x34e   : > { %1474 = vrot.lane.b32.xlu0 %v1458_v41, %s3447_s27 }
 0x34f   : > { %v870_v46 = vpop.permute.xlu0 %869  ;;  %v852_v50 = vpop.permute.xlu1 %851 }
 0x350   : > { %v872_v47 = vsel %vm858_vm1, %v866_v42, %v870_v46 }
 0x351   : > { %v874_v49 = vmul.f32 %v872_v47, %v3902_v58 }
 0x353   : > { %v875_v51 = vadd.f32 %v874_v49, %v873_v48  ;;  %v856_v52 = vpop.permute.xlu0 %855 }
 0x354   : > { %v859_v54 = vsel %vm858_vm1, %v852_v50, %v856_v52 }
 0x355   : > { %v861_v56 = vmul.f32 %v859_v54, %v3902_v58  ;;  %2817 = vmatpush3.xpose.msk.msra.mxu0 %vm876_vm2, %v875_v51 }
 0x356   : > { %2826 = vmatprep.subr.mxu0 %v3441_v4 }
 0x357   : > { %v862_v57 = vadd.f32 %v861_v56, %v860_v55 }
 0x359   : > { %2819 = vmatmul.mubr.msk.f32.vlgmr.msra.gmra.mrb[4].mxu0 %vm876_vm2, %v862_v57 }
 0x35a   : > { %2828 = vmatprep.mubr.msk.f32.mxu0 %vm3443_vm0, %v3441_v4 }
 0x3a8   : > { %v1074_v59 = vpop.permute.xlu0 %1073 }
 0x3ac   : > { %v1077_v45 = vpop.permute.xlu1 %1076 }
 0x3ad   : > { %2827 = vmatpush3.xpose.msk.msra.mxu0 %vm876_vm2, %v1077_v45 }
 0x3ae   : > { %2836 = vmatprep.subr.mxu0 %v3441_v4 }
 0x3b0   : > { %2829 = vmatmul.mubr.msk.f32.vlgmr.msra.gmra.mrb[6].mxu0 %vm876_vm2, %v1074_v59 }
 0x3b1   : > { %2838 = vmatprep.mubr.msk.f32.mxu0 %vm3443_vm0, %v3441_v4 }
 0x3b8   : > { %v1278_v43 = vpop.permute.xlu1 %1277 }
 0x3b9   : > { %2837 = vmatpush3.xpose.msk.msra.mxu0 %vm876_vm2, %v1278_v43 }
 0x3ba   : > { %2846 = vmatprep.subr.mxu0 %v3441_v4 }
 0x3bc   : > { %v1478_v53 = vpop.permute.xlu1 %1477  ;;  %v1275_v58 = vpop.permute.xlu0 %1274 }
 0x3bd   : > { %2839 = vmatmul.mubr.msk.f32.vlgmr.msra.gmra.mrb[8].mxu0 %vm876_vm2, %v1275_v58  ;;  %v3053_v58 = vld [vmem:[%s3804_s5] sm:$0xff]  }
 0x3be   : > { %2847 = vmatpush3.xpose.msk.msra.mxu0 %vm876_vm2, %v1478_v53  ;;  %2848 = vmatprep.mubr.msk.f32.mxu0 %vm3443_vm0, %v3441_v4 }
 0x3bf   : > { %2856 = vmatprep.subr.bf16.mxu0 %v3441_v4 }
 0x3c0   : > { %v1475_v60 = vpop.permute.xlu0 %1474 }
 0x3c1   : > { %2849 = vmatmul.mubr.msk.f32.vlgmr.msra.gmra.mrb[10].mxu0 %vm876_vm2, %v1475_v60  ;;  %v3054_v60 = vld [vmem:[%s3804_s5 + $0x8] sm:$0xff]  }
 0x3c2   : > { %2872 = vmatprep.mubr.msk.bf16.mxu0 %vm3443_vm0, %v3441_v4  ;;  %2857 = vmatpush3.bf16.msra.mxu0 %v3053_v58 }
 0x3c3   : > { %2858 = vmatprep.subr.bf16.mxu0 %v3441_v4 }
 0x3c6   : > { %2859 = vmatpush3.bf16.msra.mxu0 %v3054_v60  ;;  %v1766_v60 = vld [vmem:[%s568_s4] sm:$0x1] }
 0x3c7   : > { %2860 = vmatprep.subr.bf16.mxu0 %v3441_v4 }
 0x42c   : > { %v949_v62 = vpop.f32.mrb[4].mxu0 }
 0x42d   : > { %v953_v63 = vmul.f32 0.17677669, %v949_v62  ;;  %v2820_v0 = vpop.f32.mrb[5].mxu0 }
 0x42e   : > { %v3056_v0 = vld [vmem:[%s3804_s5 + $0x18] sm:$0xff]  }
 0x42f   : > { %v954_v2 = vsel %vm848_vm3, %v953_v63, -1e+30  ;;  %v3055_v63 = vld [vmem:[%s3804_s5 + $0x10] sm:$0xff]  }
 0x430   : > { %v956_v3 = vsel %vm955_vm4, %v954_v2, -inf  ;;  %2861 = vmatpush3.bf16.msra.mxu0 %v3055_v63 }
 0x431   : > { %957 = vmax.xlane.f32.xlu1 %v956_v3  ;;  %2862 = vmatprep.subr.bf16.mxu0 %v3441_v4 }
 0x434   : > { %2863 = vmatpush3.bf16.msra.mxu0 %v3056_v0 }
 0x435   : > { %2864 = vmatprep.subr.bf16.mxu0 %v3441_v4 }
 0x483   : > { %v1148_v5 = vpop.f32.mrb[6].mxu0 }
 0x484   : > { %v1152_v6 = vmul.f32 0.17677669, %v1148_v5  ;;  %v2830_v7 = vpop.f32.mrb[7].mxu0  ;;  %v3057_v5 = vld [vmem:[%s3804_s5 + $0x20] sm:$0xff]  }
 0x485   : > { %2865 = vmatpush3.bf16.msra.mxu0 %v3057_v5  ;;  %v3059_v7 = vld [vmem:[%s3804_s5 + $0x30] sm:$0xff]   ;;  %v3109_v5 = vld [vmem:[%s3774_s9 + $0x40] sm:$0xff]  }
 0x486   : > { %v1153_v8 = vsel %vm848_vm3, %v1152_v6, -1e+30  ;;  %v3058_v6 = vld [vmem:[%s3804_s5 + $0x28] sm:$0xff]   ;;  %2866 = vmatprep.subr.bf16.mxu0 %v3441_v4 }
 0x487   : > { %v1154_v33 = vsel %vm955_vm4, %v1153_v8, -inf }
 0x488   : > { %1155 = vmax.xlane.f32.xlu0 %v1154_v33 }
 0x489   : > { %2867 = vmatpush3.bf16.msra.mxu0 %v3058_v6  ;;  %v3110_v6 = vld [vmem:[%s3774_s9] sm:$0xff]  }
 0x48a   : > { %2868 = vmatprep.subr.bf16.mxu0 %v3441_v4 }
 0x48d   : > { %2869 = vmatpush3.bf16.msra.mxu0 %v3059_v7  ;;  %v3111_v7 = vld [vmem:[%s3774_s9 + $0x48] sm:$0xff]  }
 0x48e   : > { %2870 = vmatprep.subr.bf16.mxu0 %v3441_v4 }
 0x490   : > { %v1349_v9 = vpop.f32.mrb[8].mxu0 }
 0x491   : > { %v1353_v10 = vmul.f32 0.17677669, %v1349_v9  ;;  %v2840_v11 = vpop.f32.mrb[9].mxu0 }
 0x493   : > { %v1354_v12 = vsel %vm848_vm3, %v1353_v10, -1e+30 }
 0x494   : > { %v1549_v13 = vpop.f32.mrb[10].mxu0  ;;  %v1355_v14 = vsel %vm955_vm4, %v1354_v12, -inf }
 0x495   : > { %v1553_v15 = vmul.f32 0.17677669, %v1549_v13  ;;  %1356 = vmax.xlane.f32.xlu0 %v1355_v14  ;;  %v2850_v16 = vpop.f32.mrb[11].mxu0 }
 0x496   : > { %v3061_v16 = vld [vmem:[%s3768_s7] ss:$16 sps:$4 sm:$0xff]  }
 0x497   : > { %v1554_v17 = vsel %vm848_vm3, %v1553_v15, -1e+30 }
 0x498   : > { %v1555_v18 = vsel %vm955_vm4, %v1554_v17, -inf }
 0x499   : > { %1556 = vmax.xlane.f32.xlu1 %v1555_v18  ;;  %v3064_v18 = vld [vmem:[%s3768_s7 + $0x8] ss:$16 sps:$4 sm:$0xff]  }
 0x4be   : > { %v958_v19 = vpop.xlane.xlu1 %957 }
 0x4bf   : > { %v959_v20 = vsub.f32 %v954_v2, %v958_v19  ;;  %v3066_v19 = vld [vmem:[%s3768_s7 + $0xc] ss:$16 sps:$4 sm:$0xff]  }
 0x4c1   : > { %v960_v21 = vmul.f32 1.442695, %v959_v20  ;;  %v3069_v20 = vld [vmem:[%s3768_s7 + $0x24] ss:$16 sps:$4 sm:$0xff]  }
 0x4c3   : > { %3127 = vpow2.f32 %v960_v21  ;;  %v3072_v21 = vld [vmem:[%s3768_s7 + $0x2c] ss:$16 sps:$4 sm:$0xff]  }
 0x4cd   : > { %v3128_v22 = vpop.eup %3127 }
 0x4ce   : > { %v962_v23 = vsel %vm955_vm4, %v3128_v22, 0.0 }
 0x4cf   : > { %963 = vadd.xlane.f32.xlu0 %v962_v23  ;;  %v3070_v23 = vld [vmem:[%s3768_s7 + $0x28] ss:$16 sps:$4 sm:$0xff]  }
 0x515   : > { %v1156_v24 = vpop.xlane.xlu0 %1155 }
 0x516   : > { %v1157_v25 = vsub.f32 %v1153_v8, %v1156_v24  ;;  %v3060_v8 = vld [vmem:[%s3804_s5 + $0x38] sm:$0xff]  }
 0x517   : > { %2871 = vmatpush3.bf16.msra.mxu0 %v3060_v8  ;;  %v3075_v24 = vld [vmem:[%s3768_s7 + $0x44] ss:$16 sps:$4 sm:$0xff]   ;;  %v3112_v8 = vld [vmem:[%s3774_s9 + $0x8] sm:$0xff]  }
 0x518   : > { %v1158_v27 = vmul.f32 1.442695, %v1157_v25  ;;  %2017 = vmatprep.subr.bf16.mxu0 %v3066_v19  ;;  %v3078_v25 = vld [vmem:[%s3768_s7 + $0x4c] ss:$16 sps:$4 sm:$0xff]  }
 0x51a   : > { %3129 = vpow2.f32 %v1158_v27  ;;  %v3076_v27 = vld [vmem:[%s3768_s7 + $0x48] ss:$16 sps:$4 sm:$0xff]  }
 0x522   : > { %v1357_v28 = vpop.xlane.xlu0 %1356 }
 0x523   : > { %v1358_v29 = vsub.f32 %v1354_v12, %v1357_v28 }
 0x524   : > { %v3130_v30 = vpop.eup %3129 }
 0x525   : > { %v1359_v34 = vmul.f32 1.442695, %v1358_v29  ;;  %v1160_v31 = vsel %vm955_vm4, %v3130_v30, 0.0 }
 0x526   : > { %1161 = vadd.xlane.f32.xlu1 %v1160_v31  ;;  %v1557_v36 = vpop.xlane.xlu1 %1556 }
 0x527   : > { %3131 = vpow2.f32 %v1359_v34  ;;  %v1558_v38 = vsub.f32 %v1554_v17, %v1557_v36  ;;  %v3063_v17 = vld [vmem:[%s3768_s7 + $0x4] ss:$16 sps:$4 sm:$0xff]  }
 0x529   : > { %v1559_v39 = vmul.f32 1.442695, %v1558_v38  ;;  %v3081_v38 = vld [vmem:[%s3768_s7 + $0x64] ss:$16 sps:$4 sm:$0xff]  }
 0x52b   : > { %3133 = vpow2.f32 %v1559_v39  ;;  %v3084_v39 = vld [vmem:[%s3768_s7 + $0x6c] ss:$16 sps:$4 sm:$0xff]  }
 0x531   : > { %v3132_v32 = vpop.eup %3131 }
 0x532   : > { %v1361_v35 = vsel %vm955_vm4, %v3132_v32, 0.0 }
 0x533   : > { %1362 = vadd.xlane.f32.xlu0 %v1361_v35 }
 0x535   : > { %v3134_v40 = vpop.eup %3133 }
 0x536   : > { %v1561_v41 = vsel %vm955_vm4, %v3134_v40, 0.0 }
 0x537   : > { %1366 = vrot.lane.b32.xlu1 %v3872_v44, %s3449_s16 }
 0x549   : > { %1166 = vrot.lane.b32.xlu0 %v3872_v44, %s3450_s15 }
 0x55b   : > { %1562 = vadd.xlane.f32.xlu1 %v1561_v41  ;;  %v3082_v41 = vld [vmem:[%s3768_s7 + $0x68] ss:$16 sps:$4 sm:$0xff]  }
 0x55c   : > { %v964_v42 = vpop.xlane.xlu0 %963 }
 0x55d   : > { %3135 = vrcp.f32 %v964_v42  ;;  %v3087_v42 = vld [vmem:[%s3768_s7 + $0x84] ss:$16 sps:$4 sm:$0xff]  }
 0x567   : > { %v3136_v46 = vpop.eup %3135 }
 0x568   : > { %v966_v47 = vmul.f32 %v3136_v46, %v3128_v22  ;;  %v3067_v22 = vld [vmem:[%s3768_s7 + $0x20] ss:$16 sps:$4 sm:$0xff]   ;;  %v3088_v46 = vld [vmem:[%s3768_s7 + $0x88] ss:$16 sps:$4 sm:$0xff]  }
 0x56a   : > { %2824 = vmatmul.mubr.msk.f32.vlgmr.msra.gmra.mrb[4].mxu1 %vm955_vm4, %v966_v47  ;;  %v3090_v47 = vld [vmem:[%s3768_s7 + $0x8c] ss:$16 sps:$4 sm:$0xff]  }
 0x56b   : > { %2833 = vmatprep.mubr.msk.f32.mxu1 %vm3443_vm0, %v3441_v4 }
 0x56c   : > { %1566 = vrot.lane.b32.xlu1 %v3872_v44, %s3447_s27 }
 0x5b3   : > { %v1162_v48 = vpop.xlane.xlu1 %1161 }
 0x5b4   : > { %3137 = vrcp.f32 %v1162_v48  ;;  %v3093_v48 = vld [vmem:[%s3768_s7 + $0xa4] ss:$16 sps:$4 sm:$0xff]  }
 0x5b7   : > { %v1367_v54 = vpop.permute.xlu1 %1366 }
 0x5be   : > { %v3138_v50 = vpop.eup %3137 }
 0x5bf   : > { %v1164_v51 = vmul.f32 %v3138_v50, %v3130_v30  ;;  %v3091_v50 = vld [vmem:[%s3768_s7 + $0xa0] ss:$16 sps:$4 sm:$0xff]  }
 0x5c0   : > { %v1363_v49 = vpop.xlane.xlu0 %1362 }
 0x5c1   : > { %3139 = vrcp.f32 %v1363_v49  ;;  %v3096_v49 = vld [vmem:[%s3768_s7 + $0xac] ss:$16 sps:$4 sm:$0xff]  }
 0x5c4   : > { %v1167_v52 = vpop.permute.xlu0 %1166 }
 0x5c5   : > { %2832 = vmatpush3.msra.mxu1 %v1167_v52  ;;  %v3099_v52 = vld [vmem:[%s3768_s7 + $0xc4] ss:$16 sps:$4 sm:$0xff]  }
 0x5c6   : > { %2834 = vmatmul.mubr.msk.f32.vlgmr.msra.gmra.mrb[6].mxu1 %vm955_vm4, %v1164_v51  ;;  %2841 = vmatprep.subr.mxu1 %v3441_v4  ;;  %v3094_v51 = vld [vmem:[%s3768_s7 + $0xa8] ss:$16 sps:$4 sm:$0xff]  }
 0x5c7   : > { %2842 = vmatpush3.msra.mxu1 %v1367_v54  ;;  %2843 = vmatprep.mubr.msk.f32.mxu1 %vm3443_vm0, %v3441_v4  ;;  %v3102_v54 = vld [vmem:[%s3768_s7 + $0xcc] ss:$16 sps:$4 sm:$0xff]  }
 0x5c8   : > { %2851 = vmatprep.subr.mxu1 %v3441_v4 }
 0x5cb   : > { %v3140_v44 = vpop.eup %3139 }
 0x5cc   : > { %v1365_v55 = vmul.f32 %v3140_v44, %v3132_v32  ;;  %v3097_v44 = vld [vmem:[%s3768_s7 + $0xc0] ss:$16 sps:$4 sm:$0xff]  }
 0x5ce   : > { %2844 = vmatmul.mubr.msk.f32.vlgmr.msra.gmra.mrb[8].mxu1 %vm955_vm4, %v1365_v55  ;;  %v3100_v55 = vld [vmem:[%s3768_s7 + $0xc8] ss:$16 sps:$4 sm:$0xff]  }
 0x5cf   : > { %2853 = vmatprep.mubr.msk.f32.mxu1 %vm3443_vm0, %v3441_v4 }
 0x5e8   : > { %v1563_v56 = vpop.xlane.xlu1 %1562 }
 0x5e9   : > { %3141 = vrcp.f32 %v1563_v56  ;;  %v3105_v56 = vld [vmem:[%s3768_s7 + $0xe4] ss:$16 sps:$4 sm:$0xff]  }
 0x5ec   : > { %v1567_v57 = vpop.permute.xlu1 %1566 }
 0x5ed   : > { %2852 = vmatpush3.msra.mxu1 %v1567_v57  ;;  %v3108_v57 = vld [vmem:[%s3768_s7 + $0xec] ss:$16 sps:$4 sm:$0xff]  }
 0x5ee   : > { %1976 = vmatprep.subr.bf16.mxu1 %v3063_v17  ;;  %v3123_v17 = vld [vmem:[%s3774_s9 + $0x78] sm:$0xff]  }
 0x5f3   : > { %v3142_v45 = vpop.eup %3141 }
 0x5f4   : > { %v1565_v59 = vmul.f32 %v3142_v45, %v3134_v40  ;;  %v3079_v40 = vld [vmem:[%s3768_s7 + $0x60] ss:$16 sps:$4 sm:$0xff]  }
 0x5f5   : > { %v3103_v45 = vld [vmem:[%s3768_s7 + $0xe0] ss:$16 sps:$4 sm:$0xff]  }
 0x5f6   : > { %2854 = vmatmul.mubr.msk.f32.vlgmr.msra.gmra.mrb[10].mxu1 %vm955_vm4, %v1565_v59  ;;  %v3106_v59 = vld [vmem:[%s3768_s7 + $0xe8] ss:$16 sps:$4 sm:$0xff]  }
 0x5f7   : > { %2008 = vmatprep.mubr.bf16.mxu1 %v3442_v26  ;;  %1977 = vmatpush1.bf16.msra.mxu1 %v3061_v16  ;;  %v3122_v16 = vld [vmem:[%s3774_s9 + $0x30] sm:$0xff]  }
 0x5f8   : > { %1978 = vmatprep.subr.bf16.mxu1 %v3069_v20 }
 0x5fb   : > { %1979 = vmatpush1.bf16.msra.mxu1 %v3067_v22 }
 0x5fc   : > { %1980 = vmatprep.subr.bf16.mxu1 %v3075_v24 }
 0x63d   : > { %v1036_v43 = vpop.f32.mrb[4].mxu1 }
 0x63e   : > { %v2825_v53 = vpop.f32.mrb[5].mxu1 }
 0x699   : > { %v1238_v61 = vpop.f32.mrb[6].mxu1 }
 0x69a   : > { %1643 = vrot.lane.b32.xlu0 %v1238_v61, %s3447_s27  ;;  %v2835_v62 = vpop.f32.mrb[7].mxu1  ;;  %v1777_v61 = vpack.i.b16 %v1766_v60, %v1766_v60  ;;  %v3167_v60 = vld [vmem:[#allocation9 + $0x40] ss:$8 sps:$4 sm:$0xff] (!%p2714_p7)  }
 0x69c   : > { %v1782_v0 = vrot.slane %v1777_v61, %v3862_v37  ;;  %v3168_v61 = vld [vmem:[#allocation9 + $0x54] ss:$8 sps:$4 sm:$0xff] (!%p2714_p7)  }
 0x6a1   : > { %v1438_v2 = vpop.f32.mrb[8].mxu1 }
 0x6a2   : > { %1647 = vrot.lane.b32.xlu1 %v1438_v2, %s3449_s16  ;;  %v2845_v3 = vpop.f32.mrb[9].mxu1 }
 0x6c9   : > { %v1638_v33 = vpop.f32.mrb[10].mxu1 }
 0x6ca   : > { %1651 = vrot.lane.b32.xlu0 %v1638_v33, %s3450_s15  ;;  %v2855_v9 = vpop.f32.mrb[11].mxu1  ;;  %v3113_v33 = vld [vmem:[%s3774_s9 + $0x50] sm:$0xff]  }
 0x6cb   : > { %v3114_v9 = vld [vmem:[%s3774_s9 + $0x10] sm:$0xff]  }
 0x70c   : > { %v1644_v10 = vpop.permute.xlu0 %1643 }
 0x70d   : > { %v1654_v12 = vsel %vm876_vm2, %v1036_v43, %v1644_v10  ;;  %v3115_v10 = vld [vmem:[%s3774_s9 + $0x58] sm:$0xff]  }
 0x714   : > { %v1648_v11 = vpop.permute.xlu1 %1647 }
 0x715   : > { %v1656_v4 = vsel %vm1655_vm5, %v1654_v12, %v1648_v11  ;;  %v3116_v11 = vld [vmem:[%s3774_s9 + $0x18] sm:$0xff]   ;;  %v3117_v12 = vld [vmem:[%s3774_s9 + $0x60] sm:$0xff]  }
 0x73c   : > { %v1652_v13 = vpop.permute.xlu0 %1651 }
 0x73d   : > { %v1658_v14 = vsel %vm1657_vm6, %v1656_v4, %v1652_v13  ;;  %v3118_v4 = vld [vmem:[%s3774_s9 + $0x20] sm:$0xff]   ;;  %v3119_v13 = vld [vmem:[%s3774_s9 + $0x68] sm:$0xff]  }
 0x73e   : > { %v1659_v15 = vpack.c.bf16 %v1658_v14, %v1658_v14  ;;  %v3120_v14 = vld [vmem:[%s3774_s9 + $0x28] sm:$0xff]  }
 0x740   : > { %2873 = vmatmul.mubr.bf16.vlgmr.msra.gmra.mrb[12].mxu0 %v1659_v15  ;;  %v3121_v15 = vld [vmem:[%s3774_s9 + $0x70] sm:$0xff]  }
 0x741   : > { %2049 = vmatprep.mubr.bf16.mxu0 %v3442_v26  ;;  %2018 = vmatpush1.bf16.msra.mxu0 %v3064_v18  ;;  %v3073_v26 = vld [vmem:[%s3768_s7 + $0x40] ss:$16 sps:$4 sm:$0xff]   ;;  %v3124_v18 = vld [vmem:[%s3774_s9 + $0x38] sm:$0xff]   ;;  %s4233_s9 = sld [smem:[#allocation35_spill]] (!%p2714_p7) }
 0x742   : > { %2019 = vmatprep.subr.bf16.mxu0 %v3072_v21  ;;  %1981 = vmatpush1.bf16.msra.mxu1 %v3073_v26 }
 0x743   : > { %1982 = vmatprep.subr.bf16.mxu1 %v3081_v38 }
 0x745   : > { %2020 = vmatpush1.bf16.msra.mxu0 %v3070_v23 }
 0x746   : > { %2021 = vmatprep.subr.bf16.mxu0 %v3078_v25  ;;  %1983 = vmatpush1.bf16.msra.mxu1 %v3079_v40 }
 0x747   : > { %1984 = vmatprep.subr.bf16.mxu1 %v3087_v42 }
 0x749   : > { %2022 = vmatpush1.bf16.msra.mxu0 %v3076_v27 }
 0x74a   : > { %2023 = vmatprep.subr.bf16.mxu0 %v3084_v39 }
 0x74d   : > { %2024 = vmatpush1.bf16.msra.mxu0 %v3082_v41 }
 0x74e   : > { %2025 = vmatprep.subr.bf16.mxu0 %v3090_v47 }
 0x751   : > { %2026 = vmatpush1.bf16.msra.mxu0 %v3088_v46 }
 0x752   : > { %2027 = vmatprep.subr.bf16.mxu0 %v3096_v49 }
 0x755   : > { %2028 = vmatpush1.bf16.msra.mxu0 %v3094_v51 }
 0x756   : > { %2029 = vmatprep.subr.bf16.mxu0 %v3102_v54 }
 0x759   : > { %2030 = vmatpush1.bf16.msra.mxu0 %v3100_v55  ;;  %v3155_v55 = vld [vmem:[#allocation9] ss:$8 sps:$4 sm:$0xff] (!%p2714_p7)  }
 0x75a   : > { %2031 = vmatprep.subr.bf16.mxu0 %v3108_v57  ;;  %v3156_v57 = vld [vmem:[#allocation9 + $0x14] ss:$8 sps:$4 sm:$0xff] (!%p2714_p7)  }
 0x75d   : > { %2032 = vmatpush1.bf16.msra.mxu0 %v3106_v59  ;;  %v3159_v59 = vld [vmem:[#allocation9 + $0x24] ss:$8 sps:$4 sm:$0xff] (!%p2714_p7)  }
 0x813   : > { %v1758_v28 = vpop.f32.mrb[12].mxu0 }
 0x814   : > { %v1764_v29 = vpack.c.bf16 %v1758_v28, %v1758_v28  ;;  %v2874_v30 = vpop.f32.mrb[13].mxu0 }
 0x815   : > { %v1761_v34 = vpop.f32.mrb[14].mxu0 }
 0x816   : > { %v4040_v31 = vadd.bf16 %v1764_v29, %v3809_v1  ;;  %v2875_v32 = vpop.f32.mrb[15].mxu0  ;;  %v3085_v1 = vld [vmem:[%s3768_s7 + $0x80] ss:$16 sps:$4 sm:$0xff]  }
 0x817   : > { %1985 = vmatpush1.bf16.msra.mxu1 %v3085_v1 }
 0x818   : > { %v1767_v35 = vunpack.c.l.bf16 %v4040_v31  ;;  %1986 = vmatprep.subr.bf16.mxu1 %v3093_v48 }
 0x81a   : > { %v1768_v36 = vmul.f32 %v1767_v35, %v1767_v35 }
 0x81b   : > { %1987 = vmatpush1.bf16.msra.mxu1 %v3091_v50 }
 0x81c   : > { %1769 = vadd.xlane.f32.xlu1 %v1768_v36  ;;  %1988 = vmatprep.subr.bf16.mxu1 %v3099_v52 }
 0x81f   : > { %1989 = vmatpush1.bf16.msra.mxu1 %v3097_v44  ;;  %v3153_v44 = vld [vmem:[#allocation9 + $0x4] ss:$8 sps:$4 sm:$0xff] (!%p2714_p7)  }
 0x820   : > { %1990 = vmatprep.subr.bf16.mxu1 %v3105_v56  ;;  %2365 = vmatprep.subr.bf16.mxu0 (!%p2714_p7), %v3153_v44 }
 0x823   : > { %1991 = vmatpush1.bf16.msra.mxu1 %v3103_v45  ;;  %v3158_v45 = vld [vmem:[#allocation9 + $0x10] ss:$8 sps:$4 sm:$0xff] (!%p2714_p7)  }
 0x824   : > { %2774 = vmatprep.subr.bf16.mxu1 %v3109_v5  ;;  %v3176_v5 = vld [vmem:[#allocation9 + $0x70] ss:$8 sps:$4 sm:$0xff] (!%p2714_p7)  }
 0x8a9   : > { %v1770_v43 = vpop.xlane.xlu1 %1769 }
 0x8aa   : > { %v1771_v53 = vmul.f32 0.0078125, %v1770_v43  ;;  %v3161_v43 = vld [vmem:[#allocation9 + $0x20] ss:$8 sps:$4 sm:$0xff] (!%p2714_p7)  }
 0x8ac   : > { %v1772_v58 = vadd.f32 1e-05, %v1771_v53  ;;  %v3164_v53 = vld [vmem:[#allocation9 + $0x30] ss:$8 sps:$4 sm:$0xff] (!%p2714_p7)  }
 0x8ae   : > { %3143 = vrsqrt.f32 %v1772_v58  ;;  %v3165_v58 = vld [vmem:[#allocation9 + $0x44] ss:$8 sps:$4 sm:$0xff] (!%p2714_p7)  }
 0x8b8   : > { %v3144_v62 = vpop.eup %3143 }
 0x8b9   : > { %v1774_v63 = vmul.f32 %v3144_v62, %v1767_v35  ;;  %v3170_v62 = vld [vmem:[#allocation9 + $0x50] ss:$8 sps:$4 sm:$0xff] (!%p2714_p7)  }
 0x8bb   : > { %v1775_v2 = vpack.c.bf16 %v1774_v63, %v1774_v63  ;;  %v3171_v63 = vld [vmem:[#allocation9 + $0x64] ss:$8 sps:$4 sm:$0xff] (!%p2714_p7)  }
 0x8bd   : > { %v1783_v3 = vmul.bf16 %v1782_v0, %v1775_v2  ;;  %v3451_v0 = vmov (!%p2714_p7), 0   ;;  %v3173_v2 = vld [vmem:[#allocation9 + $0x60] ss:$8 sps:$4 sm:$0xff] (!%p2714_p7)  }
 0x8bf   : > { %2009 = vmatmul.mubr.bf16.vlgmr.msra.gmra.mrb[12].mxu1 %v1783_v3  ;;  %2050 = vmatmul.mubr.bf16.vlgmr.msra.gmra.mrb[16].mxu0 %v1783_v3  ;;  %v3174_v3 = vld [vmem:[#allocation9 + $0x74] ss:$8 sps:$4 sm:$0xff] (!%p2714_p7)  }
 0x8c0   : > { %2775 = vmatpush3.bf16.msra.mxu1 %v3110_v6  ;;  %2366 = vmatpush1.bf16.msra.mxu0 (!%p2714_p7), %v3155_v55 }
 0x8c1   : > { %2776 = vmatprep.subr.bf16.mxu1 %v3111_v7  ;;  %2367 = vmatprep.subr.bf16.mxu0 (!%p2714_p7), %v3156_v57 }
 0x8c2   : > { %2397 = vmatprep.mubr.bf16.mxu0 (!%p2714_p7), %v3451_v0 }
 0x8c4   : > { %2777 = vmatpush3.bf16.msra.mxu1 %v3112_v8  ;;  %2368 = vmatpush1.bf16.msra.mxu0 (!%p2714_p7), %v3158_v45 }
 0x8c5   : > { %2778 = vmatprep.subr.bf16.mxu1 %v3113_v33  ;;  %2369 = vmatprep.subr.bf16.mxu0 (!%p2714_p7), %v3159_v59  ;;  %v2251_v33 = vld [vmem:[%s4233_s9] sm:$0x1] (!%p2714_p7) }
 0x8c8   : > { %2779 = vmatpush3.bf16.msra.mxu1 %v3114_v9  ;;  %2370 = vmatpush1.bf16.msra.mxu0 (!%p2714_p7), %v3161_v43  ;;  %v2262_v9 = vpack.i.b16 (!%p2714_p7), %v2251_v33, %v2251_v33 }
 0x8c9   : > { %2780 = vmatprep.subr.bf16.mxu1 %v3115_v10 }
 0x8cc   : > { %2781 = vmatpush3.bf16.msra.mxu1 %v3116_v11 }
 0x8cd   : > { %2782 = vmatprep.subr.bf16.mxu1 %v3117_v12  ;;  %v2267_v12 = vrot.slane (!%p2714_p7), %v2262_v9, %v3862_v37 }
 0x8d0   : > { %2783 = vmatpush3.bf16.msra.mxu1 %v3118_v4 }
 0x8d1   : > { %2784 = vmatprep.subr.bf16.mxu1 %v3119_v13 }
 0x8d4   : > { %2785 = vmatpush3.bf16.msra.mxu1 %v3120_v14 }
 0x8d5   : > { %2786 = vmatprep.subr.bf16.mxu1 %v3121_v15 }
 0x8d8   : > { %2787 = vmatpush3.bf16.msra.mxu1 %v3122_v16 }
 0x8d9   : > { %2788 = vmatprep.subr.bf16.mxu1 %v3123_v17 }
 0x8dc   : > { %2789 = vmatpush3.bf16.msra.mxu1 %v3124_v18 }
 0x992   : > { %v2010_v19 = vpop.f32.mrb[12].mxu1  ;;  %v2051_v20 = vpop.f32.mrb[16].mxu0 }
 0x993   : > { %v2696_v21 = vmul.f32 -1.442695, %v2010_v19  ;;  %v2012_v22 = vpop.f32.mrb[13].mxu1  ;;  %v2053_v23 = vpop.f32.mrb[17].mxu0 }
 0x994   : > { %v2697_v24 = vmul.f32 -1.442695, %v2012_v22  ;;  %v2014_v25 = vpop.f32.mrb[14].mxu1  ;;  %v2055_v26 = vpop.f32.mrb[18].mxu0 }
 0x995   : > { %3145 = vpow2.f32 %v2696_v21  ;;  %v2015_v27 = vpop.f32.mrb[15].mxu1  ;;  %v2056_v28 = vpop.f32.mrb[19].mxu0 }
 0x996   : > { %3147 = vpow2.f32 %v2697_v24 }
 0x99f   : > { %v3146_v29 = vpop.eup %3145 }
 0x9a0   : > { %v3148_v30 = vpop.eup %3147  ;;  %v2064_v34 = vadd.f32 1.0, %v3146_v29 }
 0x9a1   : > { %v2065_v32 = vadd.f32 1.0, %v3148_v30 }
 0x9a2   : > { %3149 = vrcp.f32 %v2064_v34 }
 0x9a3   : > { %3151 = vrcp.f32 %v2065_v32 }
 0x9ac   : > { %v3150_v35 = vpop.eup %3149 }
 0x9ad   : > { %v3152_v36 = vpop.eup %3151  ;;  %v2070_v38 = vmul.f32 %v3150_v35, %v2010_v19 }
 0x9ae   : > { %v2071_v39 = vmul.f32 %v3152_v36, %v2012_v22 }
 0x9af   : > { %v2072_v40 = vmul.f32 %v2070_v38, %v2051_v20 }
 0x9b0   : > { %v2073_v41 = vmul.f32 %v2071_v39, %v2053_v23 }
 0x9b1   : > { %v2074_v42 = vpack.c.bf16 %v2072_v40, %v2072_v40 }
 0x9b2   : > { %v2075_v1 = vpack.c.bf16 %v2073_v41, %v2073_v41 }
 0x9b4   : > { %2236 = vmatprep.mubr.bf16.mxu1 %v2075_v1 }
 0x9b5   : > { %2237 = vmatmul.mubr.bf16.vlgmr.msra.gmra.mrb[16].mxu1 %v2074_v42 }
 0xa88   : > { %v2790_v46 = vpop.f32.mrb[16].mxu1 }
 0xa89   : > { %v2791_v47 = vpop.f32.mrb[17].mxu1 }
 0xa8a   : > { %v2792_v48 = vadd.f32 %v2791_v47, %v2790_v46  ;;  %v2793_v49 = vpop.f32.mrb[18].mxu1  ;;  %2250 = sbr.rel (%p2714_p7) target bundleno = 3086 (0xc0e), region = 88 }
 0xa8b   : > { %v2794_v50 = vpop.f32.mrb[19].mxu1 }
 0xa8c   : > { %v2244_v51 = vpack.c.bf16 %v2792_v48, %v2792_v48 }
 0xa8e   : > { %v2245_v52 = vadd.bf16 %v2244_v51, %v4040_v31  ;;  %v3162_v31 = vld [vmem:[#allocation9 + $0x34] ss:$8 sps:$4 sm:$0xff] (!%p2714_p7)  }
 0xa8f   : > { %2371 = vmatprep.subr.bf16.mxu0 (!%p2714_p7), %v3162_v31 }
 0xa90   : > { %2246 = vst [vmem:[#allocation2] sm:$0xf] %v2245_v52  ;;  %v2252_v54 = vunpack.c.l.bf16 (!%p2714_p7), %v2245_v52  ;;  %2372 = vmatpush1.bf16.msra.mxu0 (!%p2714_p7), %v3164_v53 }
 0xa91   : > { %2373 = vmatprep.subr.bf16.mxu0 %v3165_v58 }
 0xa92   : > { %v2253_v56 = vmul.f32 %v2252_v54, %v2252_v54 }
 0xa94   : > { %2254 = vadd.xlane.f32.xlu0 %v2253_v56  ;;  %2374 = vmatpush1.bf16.msra.mxu0 %v3167_v60 }
 0xa95   : > { %2375 = vmatprep.subr.bf16.mxu0 %v3168_v61 }
 0xa98   : > { %2376 = vmatpush1.bf16.msra.mxu0 %v3170_v62 }
 0xa99   : > { %2377 = vmatprep.subr.bf16.mxu0 %v3171_v63 }
 0xa9c   : > { %2378 = vmatpush1.bf16.msra.mxu0 %v3173_v2 }
 0xa9d   : > { %2379 = vmatprep.subr.bf16.mxu0 %v3174_v3 }
 0xaa0   : > { %2380 = vmatpush1.bf16.msra.mxu0 %v3176_v5 }
 0xb21   : > { %v2255_v6 = vpop.xlane.xlu0 %2254 }
 0xb22   : > { %v2256_v7 = vmul.f32 0.0078125, %v2255_v6 }
 0xb24   : > { %v2257_v8 = vadd.f32 1e-05, %v2256_v7 }
 0xb26   : > { %3177 = vrsqrt.f32 %v2257_v8 }
 0xb30   : > { %v3178_v10 = vpop.eup %3177 }
 0xb31   : > { %v2259_v11 = vmul.f32 %v3178_v10, %v2252_v54 }
 0xb33   : > { %v2260_v4 = vpack.c.bf16 %v2259_v11, %v2259_v11 }
 0xb35   : > { %v2268_v13 = vmul.bf16 %v2267_v12, %v2260_v4 }
 0xb37   : > { %2398 = vmatmul.mubr.bf16.vlgmr.msra.gmra.mrb[0].mxu0 %v2268_v13 }
 0xc0a   : > { %v2399_v14 = vpop.f32.mrb[0].mxu0 }
 0xc0b   : > { %2406 = vst [vmem:[%s3806_s8] sm:$0xff] %v2399_v14  ;;  %v2401_v15 = vpop.f32.mrb[1].mxu0 }
 0xc0c   : > { %2407 = vst [vmem:[%s3806_s8 + $0x8] sm:$0xff] %v2401_v15  ;;  %v2403_v16 = vpop.f32.mrb[2].mxu0 }
 0xc0d   : > { %v2404_v17 = vpop.f32.mrb[3].mxu0 }
 0xc0e PF: > { %s4234_s11 = sld [smem:[#allocation25_spill]]  ;;  %s2739_s4 = sshll.u32 %s3415_s24, 8 }
 0xc0f   : > { %s4235_s28 = sld [smem:[#allocation36_spill]]  ;;  %s2423_s17 = sshll.u32 %s3806_s8, 4  ;;  %s2424_s17 = int_to_ptr.vmem [resolvable:$true] %s2423_s17 }
 0xc10   : > { %s4236_s30 = sand.u32 1, %s3391_s18   ;;  %s3297_s3 = scalar_lea.vmem %s2424_s17, 256 }
 0xc11   : > { %s2409_s13 = scalar_lea.sflag [#allocation5], %s4236_s30  ;;  %p3298_p0 = scmp.ne.s32.totalorder %s2424_s17, %s3297_s3 }
 0xc12   : > { %s3452_s12 = smov [#allocation11]  }
 0xc13   : > { %s3301_s27 = sshll.u32 %s3452_s12, 4  ;;  %s3302_s27 = int_to_ptr.vmem [resolvable:$false] %s3301_s27 }
 0xc14   : > { %p4237_p10 = scmp.ne.s32.totalorder %s4234_s11, 0  ;;  %s3303_s2 = scalar_lea.vmem %s3302_s27, 512 }
 0xc15   : > { %s4097_s20 = scalar_lea.hbm %s4235_s28, %s2739_s4  ;;  %p3304_p4 = scmp.lt.s32.totalorder %s2424_s17, %s3302_s27 }
 0xc16   : > { %p3299_p13 = pnand %p3298_p0, %p4237_p10  ;;  %p3305_p5 = scmp.lt.s32.totalorder %s3303_s2, %s3297_s3 }
 0xc18   : > { %p3300_p11 = pneg %p3299_p13  ;;  %p3306_p9 = por %p3305_p5, %p3304_p4 }
 0xc1a   : > { %p3307_p3 = pnand %p3306_p9, %p3300_p11 }
 0xc1c   : > { %3310 = shalt.err (!%p3307_p3)
}
 0xc1d   : > { %s3311_s8 = scalar_lea.hbm %s4097_s20, 256  ;;  %s3315_s6 = scalar_lea.hbm %s4235_s28, 512 }
 0xc1e   : > { %p3312_p2 = scmp.ne.s32.totalorder %s4097_s20, %s3311_s8  ;;  %p3316_p12 = scmp.lt.u32.totalorder %s4097_s20, %s4235_s28 }
 0xc1f   : > { %p3317_p1 = scmp.lt.u32.totalorder %s3315_s6, %s3311_s8  ;;  %p3319_p0 = scmp.lt.u32.totalorder %s3311_s8, %s4097_s20 }
 0xc20   : > { %p3313_p6 = pnand %p3312_p2, %p4237_p10 }
 0xc21   : > { %p3318_p7 = por %p3317_p1, %p3316_p12 }
 0xc22   : > { %p3314_p8 = pneg %p3313_p6 }
 0xc23   : > { %p3320_p13 = por %p3319_p0, %p3318_p7 }
 0xc25   : > { %p3321_p11 = pnand %p3320_p13, %p3314_p8 }
 0xc27   : > { %3324 = shalt.err (!%p3321_p11)
}
 0xc28   : > { %2889 = dma.vmem_to_hbm [thread:$0]  (%p4237_p10), %s2424_s17, 256, %s4097_s20, %s2409_s13  }
 0xc29 PF: > { %s4238_s15 = sld [smem:[#allocation20_spill]]  ;;  %s4239_s5 = sld [smem:[#allocation16_spill]] }
 0xc2a   : > { %s4240_s22 = sld [smem:[#allocation26_spill]] }
 0xc2f   : > { %p2912_p4 = scmp.ge.s32.totalorder %s4238_s15, 2  ;;  %s2435_s1 = sand.u32 1, %s4239_s5  }
 0xc30   : > { %p4241_p5 = scmp.ne.s32.totalorder %s4240_s22, 0  ;;  %s2436_s23 = scalar_lea.sflag [#allocation5], %s2435_s1 }
 0xc32   : > { %p2906_p9 = pnand %p2912_p4, %p4241_p5 }
 0xc34   : > { %3382 = dma.done.wait (!%p2906_p9), %s2436_s23, 256  }
 0xc35   : > { %3384 = vsyncadd (!%p2906_p9), %s2436_s23, 4294967040  ;;  %s31_s27 = sadd.s32 1, %s4238_s15   ;;  %s4242_s7 = sld [smem:[#allocation17_spill]] }
 0xc36   : > { %p28_p3 = scmp.ge.s32.totalorder %s31_s27, 6   ;;  %s4243_s19 = sld [smem:[#allocation24_spill]] }
 0xc37   : > { %s4244_s9 = sld [smem:[#allocation18_spill]]  ;;  %s4245_s22 = sld [smem:[#allocation23_spill]] }
 0xc38   : > { %s4246_s24 = sld [smem:[#allocation19_spill]]  ;;  %s4247_s11 = sld [smem:[#allocation21_spill]] }
 0xc39   : > { %s4248_s26 = sld [smem:[#allocation22_spill]]  ;;  %s4249_s17 = smov %s3391_s18 }
 0xc3a   : > { %s4251_s20 = smov %s3403_s21  ;;  %s4253_s23 = smov %s3419_s25 }
 0xc3b   : > { %s4250_s18 = smov %s4242_s7  ;;  %30 = sbr.rel (!%p28_p3) target bundleno = 23 (0x17), region = 157 }
 0xc3d   : > { %s4252_s21 = smov %s4244_s9 }
 0xc3e   : > { %s4254_s25 = smov %s4247_s11 }
 0xc42   :  { %2441 = vsyncpa [#allocation4], 1 }
 0xc43   :  { %2443 = vsyncpa [#allocation4 + $0x1], 1 }
 0xc44   :  { %2444 = vsyncpa [#allocation7], 1 }
 0xc45   :  { %2446 = vsyncpa [#allocation7 + $0x1], 1 }
 0xc46   :  { %2447 = vsyncpa [#allocation10], 1 }
 0xc47   :  { %2448 = vsyncpa [#allocation5], 1 }
 0xc48   :  { %2450 = vsyncpa [#allocation5 + $0x1], 1 }

</bundles_post_ra>
